<compile_context>
chip_gen: v6e
topology: v6e:2x2x1
jax: 0.10.0
libtpu: 0.0.40
codegen_flags: <defaults>
</compile_context>

<pallas_src>
import math
from functools import partial

import jax
import jax.numpy as jnp
from jax.experimental import pallas as pl
from jax.experimental.pallas import tpu as pltpu

_LN_EPS = 1e-6


# ---------------------------------------------------------------------------
# shared math helpers (used inside kernels and in the pure-JAX reference)
# ---------------------------------------------------------------------------
def _layer_norm(x, w, b, eps=_LN_EPS):
    mu = jnp.mean(x, axis=-1, keepdims=True)
    var = jnp.mean(jnp.square(x - mu), axis=-1, keepdims=True)
    return (x - mu) * jax.lax.rsqrt(var + eps) * w + b


def _erf_approx(x):
    # Abramowitz & Stegun 7.1.26 (max abs err 1.5e-7): matches torch nn.GELU()'s
    # exact erf formulation to far below bf16 noise, using only elementwise ops
    # guaranteed to lower in Mosaic (exp, mul/add, select).
    a1, a2, a3, a4, a5 = 0.254829592, -0.284496736, 1.421413741, -1.453152027, 1.061405429
    p = 0.3275911
    z = jnp.abs(x)
    t = 1.0 / (1.0 + p * z)
    poly = ((((a5 * t + a4) * t + a3) * t + a2) * t + a1) * t
    y = 1.0 - poly * jnp.exp(-z * z)
    return jnp.where(x >= 0, y, -y)


def _gelu_erf(x):
    # torch nn.GELU() default is the exact erf GELU (not tanh).
    return 0.5 * x * (1.0 + _erf_approx(x * 0.7071067811865476))


# ---------------------------------------------------------------------------
# 1) patch embedding (normalize already folded into w/b; bf16 MXU, f32 accum)
# ---------------------------------------------------------------------------
def _patch_embed_kernel(x_ref, w_ref, b_ref, o_ref):
    o_ref[...] = (
        jnp.dot(x_ref[...].astype(jnp.bfloat16), w_ref[...],
                preferred_element_type=jnp.float32)
        + b_ref[...]
    ).astype(o_ref.dtype)


def _extract_patches(x, patch):
    # Pure layout: NCHW -> (N * n_h * n_w, C * P * P), channel-major per patch
    # (matches torchvision conv_proj weight layout).
    n, c, h, w = x.shape
    nh, nw = h // patch, w // patch
    xp = x.reshape(n, c, nh, patch, nw, patch)
    xp = xp.transpose(0, 2, 4, 1, 3, 5)
    return xp.reshape(n * nh * nw, c * patch * patch)


def patch_embed(patches, w_bf16, b_f32):
    t, k = patches.shape
    d = w_bf16.shape[1]
    # Row tile: full array for small T, else 512 (multiple of 8, fills MXU rows on
    # all generations); partial last block is handled by Pallas.
    tm = t if t <= 512 else 512
    grid = (pl.cdiv(t, tm),)
    return pl.pallas_call(
        _patch_embed_kernel,
        out_shape=jax.ShapeDtypeStruct((t, d), jnp.float32),
        grid=grid,
        in_specs=[
            pl.BlockSpec((tm, k), lambda i: (i, 0)),
            pl.BlockSpec((k, d), lambda i: (0, 0)),
            pl.BlockSpec((1, d), lambda i: (0, 0)),
        ],
        out_specs=pl.BlockSpec((tm, d), lambda i: (i, 0)),
        compiler_params=pltpu.CompilerParams(
            dimension_semantics=("parallel",),
            vmem_limit_bytes=48 * 1024 * 1024,
        ),
    )(patches, w_bf16, b_f32)


# ---------------------------------------------------------------------------
# 2) full encoder in one pallas_call: grid = (batch_tiles, layers)
#    layer axis "arbitrary": activation stays resident in VMEM scratch,
#    per-layer weights streamed via their layer-indexed BlockSpecs.
# ---------------------------------------------------------------------------
def _encoder_kernel(z0_ref, pos_ref,
                    ln1w_ref, ln1b_ref, wqkv_ref, bqkv_ref, wo_ref, bo_ref,
                    ln2w_ref, ln2b_ref, w1_ref, b1_ref, w2_ref, b2_ref,
                    lnfw_ref, lnfb_ref,
                    cls_out_ref, act_ref, *, heads):
    layer = pl.program_id(1)
    bt, s, d = act_ref.shape
    hd = d // heads
    scale = 1.0 / math.sqrt(hd)

    # Layer-0 prologue: build the embedded sequence (tokens + pos) in the resident
    # VMEM activation buffer. (CLS concat is a layout op done in the wrapper.)
    @pl.when(layer == 0)
    def _():
        act_ref[...] = z0_ref[...].astype(jnp.float32) + pos_ref[...].astype(jnp.float32)

    x = act_ref[...]                                           # (bt, S, D) f32

    # ---- LN1 -> fused QKV projection: one (bt*S, D) @ (D, 3D) MXU matmul ------
    h1 = _layer_norm(x, ln1w_ref[0], ln1b_ref[0])
    qkv = jnp.dot(h1.reshape(bt * s, d).astype(jnp.bfloat16), wqkv_ref[0],
                  preferred_element_type=jnp.float32) + bqkv_ref[0]
    qkv = qkv.reshape(bt, s, 3 * d)

    # ---- per-head attention on statically sliced q/k/v (softmax stats in f32) --
    head_outs = []
    for h in range(heads):                                     # static unroll, heads is small
        q_h = qkv[:, :, h * hd:(h + 1) * hd].astype(jnp.bfloat16)
        k_h = qkv[:, :, d + h * hd:d + (h + 1) * hd].astype(jnp.bfloat16)
        v_h = qkv[:, :, 2 * d + h * hd:2 * d + (h + 1) * hd].astype(jnp.bfloat16)
        s_h = jnp.einsum("bqd,bkd->bqk", q_h, k_h,
                         preferred_element_type=jnp.float32) * scale
        s_h = s_h - jnp.max(s_h, axis=-1, keepdims=True)
        p_h = jnp.exp(s_h)
        p_h = p_h * pl.reciprocal(jnp.sum(p_h, axis=-1, keepdims=True), approx=True)
        head_outs.append(
            jnp.einsum("bqk,bkd->bqd", p_h.astype(jnp.bfloat16), v_h,
                       preferred_element_type=jnp.float32))
    attn = jnp.concatenate(head_outs, axis=-1)                 # (bt, S, D) f32

    # single output projection on the concatenated heads
    attn = jnp.dot(attn.reshape(bt * s, d).astype(jnp.bfloat16), wo_ref[0],
                   preferred_element_type=jnp.float32) + bo_ref[0]
    x1 = x + attn.reshape(bt, s, d)                            # residual in f32

    # ---- LN2 -> MLP with exact (erf) GELU --------------------------------------
    h2 = _layer_norm(x1, ln2w_ref[0], ln2b_ref[0])
    y = jnp.dot(h2.reshape(bt * s, d).astype(jnp.bfloat16), w1_ref[0],
                preferred_element_type=jnp.float32) + b1_ref[0]
    y = _gelu_erf(y)
    y = jnp.dot(y.astype(jnp.bfloat16), w2_ref[0],
                preferred_element_type=jnp.float32) + b2_ref[0]
    x2 = x1 + y.reshape(bt, s, d)                              # residual in f32

    act_ref[...] = x2

    # Last-layer epilogue: final LayerNorm on the CLS token only (LN is per-token,
    # so LN∘select == select∘LN) -> the full (N,S,D) activation never hits HBM.
    @pl.when(layer == pl.num_programs(1) - 1)
    def _():
        cls_out_ref[...] = _layer_norm(
            x2[:, 0:1, :], lnfw_ref[...], lnfb_ref[...]).astype(cls_out_ref.dtype)


def encoder_forward(z0, prep, *, heads, batch_tile):
    n, s, d = z0.shape
    n_layers = prep["wqkv"].shape[0]
    bt = batch_tile
    assert n % bt == 0, "batch_tile must divide batch"
    grid = (n // bt, n_layers)

    def xmap(b, l):
        return (b, 0, 0)

    def cmap(b, l):
        return (0, 0, 0)

    def wmap(b, l):
        return (l, 0, 0)

    weight_arrays = [prep["ln1_w"], prep["ln1_b"], prep["wqkv"], prep["bqkv"],
                     prep["wo"], prep["bo"], prep["ln2_w"], prep["ln2_b"],
                     prep["w1"], prep["b1"], prep["w2"], prep["b2"]]
    weight_specs = [pl.BlockSpec((1,) + a.shape[1:], wmap) for a in weight_arrays]

    in_specs = ([pl.BlockSpec((bt, s, d), xmap),          # tokens (resident per batch tile)
                 pl.BlockSpec((1, s, d), cmap)]           # positional embedding (constant)
                + weight_specs
                + [pl.BlockSpec(prep["ln_w"].shape, lambda b, l: (0, 0)),
                   pl.BlockSpec(prep["ln_b"].shape, lambda b, l: (0, 0))])

    out = pl.pallas_call(
        partial(_encoder_kernel, heads=heads),
        out_shape=jax.ShapeDtypeStruct((n, 1, d), z0.dtype),
        grid_spec=pltpu.PrefetchScalarGridSpec(
            num_scalar_prefetch=0,
            grid=grid,
            in_specs=in_specs,
            out_specs=pl.BlockSpec((bt, 1, d), xmap),
            scratch_shapes=[pltpu.VMEM((bt, s, d), jnp.float32)],
        ),
        compiler_params=pltpu.CompilerParams(
            dimension_semantics=("parallel", "arbitrary"),
            vmem_limit_bytes=48 * 1024 * 1024,
        ),
    )(z0, prep["pos"], *weight_arrays, prep["ln_w"], prep["ln_b"])
    return out[:, 0, :]


# ---------------------------------------------------------------------------
# one-time parameter preprocessing (hoisted out of the jitted forward)
# ---------------------------------------------------------------------------
def prepare_params(params, mean, std, patch):
    """Fold per-channel normalize into the patch projection (exact), fuse Wq/Wk/Wv
    into one (D,3D) QKV weight, stack per-layer weights along a leading layer axis
    and cast all MXU operands to bfloat16 (accumulation stays f32 in-kernel)."""
    mean = jnp.asarray(mean, jnp.float32)
    inv_std = 1.0 / jnp.asarray(std, jnp.float32)
    pp = patch * patch
    row_scale = jnp.repeat(inv_std, pp)[:, None]           # (C*P*P, 1), channel-major rows
    row_shift = jnp.repeat(-mean * inv_std, pp)            # (C*P*P,)
    w_eff = params["w_proj"] * row_scale
    b_eff = params["b_proj"] + row_shift @ params["w_proj"]

    def stack(key, dtype=jnp.float32):
        return jnp.stack([lp[key] for lp in params["layers"]]).astype(dtype)

    prep = {
        "w_proj": w_eff.astype(jnp.bfloat16),
        "b_proj": b_eff.astype(jnp.float32),
        "cls": params["cls"].astype(jnp.float32),
        "pos": params["pos"].astype(jnp.float32),
        "ln_w": params["ln_w"].astype(jnp.float32),
        "ln_b": params["ln_b"].astype(jnp.float32),
        "ln1_w": stack("ln1_w"), "ln1_b": stack("ln1_b"),
        "wqkv": jnp.stack([jnp.concatenate([lp["wq"], lp["wk"], lp["wv"]], axis=1)
                           for lp in params["layers"]]).astype(jnp.bfloat16),
        "bqkv": jnp.stack([jnp.concatenate([lp["bq"], lp["bk"], lp["bv"]], axis=1)
                           for lp in params["layers"]]).astype(jnp.float32),
        "wo": stack("wo", jnp.bfloat16), "bo": stack("bo"),
        "ln2_w": stack("ln2_w"), "ln2_b": stack("ln2_b"),
        "w1": stack("w1", jnp.bfloat16), "b1": stack("b1"),
        "w2": stack("w2", jnp.bfloat16), "b2": stack("b2"),
    }
    return prep


# ---------------------------------------------------------------------------
# full forward (Pallas) and pure-JAX reference
# ---------------------------------------------------------------------------
@partial(jax.jit, static_argnames=("patch", "heads", "batch_tile"))
def transformer_forward(x, prep, *, patch, heads, batch_tile=1):
    n = x.shape[0]
    d = prep["w_proj"].shape[1]
    patches = _extract_patches(x, patch)                         # layout only
    tok = patch_embed(patches, prep["w_proj"], prep["b_proj"])   # Pallas (normalize folded)
    tok = tok.reshape(n, -1, d)
    cls = jnp.broadcast_to(prep["cls"], (n, 1, d))               # layout only
    z0 = jnp.concatenate([cls, tok], axis=1)                     # layout only
    # Pallas: +pos, all encoder layers, final LN and CLS select in one call.
    return encoder_forward(z0, prep, heads=heads, batch_tile=batch_tile)


def transformer_forward_ref(x, mean, std, params, *, patch, heads):
    n, c, _, _ = x.shape
    d = params["w_proj"].shape[1]
    xn = (x - mean.reshape(1, c, 1, 1)) / std.reshape(1, c, 1, 1)
    patches = _extract_patches(xn, patch)
    tok = (patches @ params["w_proj"] + params["b_proj"]).reshape(n, -1, d)
    cls = jnp.broadcast_to(params["cls"], (n, 1, d))
    z = jnp.concatenate([cls, tok], axis=1) + params["pos"]
    for lp in params["layers"]:
        s, hd = z.shape[1], d // heads
        h1 = _layer_norm(z, lp["ln1_w"], lp["ln1_b"])

        def split(t):
            return t.reshape(n, s, heads, hd).transpose(0, 2, 1, 3)

        q = split(h1 @ lp["wq"] + lp["bq"])
        k = split(h1 @ lp["wk"] + lp["bk"])
        v = split(h1 @ lp["wv"] + lp["bv"])
        sc = jnp.einsum("nhqd,nhkd->nhqk", q, k) / math.sqrt(hd)
        p = jax.nn.softmax(sc, axis=-1)
        o = jnp.einsum("nhqk,nhkd->nhqd", p, v).transpose(0, 2, 1, 3).reshape(n, s, d)
        z1 = z + (o @ lp["wo"] + lp["bo"])
        h2 = _layer_norm(z1, lp["ln2_w"], lp["ln2_b"])
        y = jax.nn.gelu(h2 @ lp["w1"] + lp["b1"], approximate=False)   # torch-exact erf GELU
        z = z1 + (y @ lp["w2"] + lp["b2"])
    z = _layer_norm(z, params["ln_w"], params["ln_b"])
    return z[:, 0]


def init_params(key, c, patch, d, heads, mlp, layers, seq):
    keys = iter(jax.random.split(key, 8 + 16 * layers))

    def nrm(shape, scl=0.05):
        return scl * jax.random.normal(next(keys), shape, jnp.float32)

    params = {
        "w_proj": nrm((c * patch * patch, d)),   # conv_proj expressed as (K, D) matmul
        "b_proj": nrm((1, d)),
        "cls": nrm((1, 1, d)),
        "pos": nrm((1, seq, d)),
        "ln_w": 1.0 + nrm((1, d), 0.1),
        "ln_b": nrm((1, d), 0.1),
        "layers": [],
    }
    for _ in range(layers):
        params["layers"].append({
            "ln1_w": 1.0 + nrm((1, d), 0.1), "ln1_b": nrm((1, d), 0.1),
            "wq": nrm((d, d)), "bq": nrm((1, d)),
            "wk": nrm((d, d)), "bk": nrm((1, d)),
            "wv": nrm((d, d)), "bv": nrm((1, d)),
            "wo": nrm((d, d)), "bo": nrm((1, d)),
            "ln2_w": 1.0 + nrm((1, d), 0.1), "ln2_b": nrm((1, d), 0.1),
            "w1": nrm((d, mlp)), "b1": nrm((1, mlp)),
            "w2": nrm((mlp, d)), "b2": nrm((1, d)),
        })
    return params


if __name__ == "__main__":
    # Small shapes consistent with the module: batch=2, 3-channel 16x16 images,
    # patch=4 -> 16 patches + CLS = 17 tokens, hidden=32, 4 heads, MLP=64, 2 layers.
    N, C, H, W = 2, 3, 16, 16
    PATCH, HIDDEN, HEADS, MLP, LAYERS = 4, 32, 4, 64, 2
    SEQ = 1 + (H // PATCH) * (W // PATCH)

    root = jax.random.PRNGKey(0)
    kx, kp = jax.random.split(root)
    x = jax.random.uniform(kx, (N, C, H, W), dtype=jnp.float32)
    mean = jnp.array([0.485, 0.456, 0.406], jnp.float32)
    std = jnp.array([0.229, 0.224, 0.225], jnp.float32)
    params = init_params(kp, C, PATCH, HIDDEN, HEADS, MLP, LAYERS, SEQ)

    # one-time weight prep (normalize fold, QKV fuse, layer stacking, bf16 cast)
    prep = prepare_params(params, mean, std, PATCH)

    # batch_tile=1 keeps 2 parallel grid steps for megacore; raise it at larger N
    # (e.g. so batch_tile*SEQ >= 256) to fill the MXU rows on v6e/v7x.
    out = transformer_forward(x, prep, patch=PATCH, heads=HEADS, batch_tile=1)
    out = jax.block_until_ready(out)

    ref = transformer_forward_ref(x, mean, std, params, patch=PATCH, heads=HEADS)
    assert out.shape == (N, HIDDEN) and out.dtype == x.dtype
    err = float(jnp.max(jnp.abs(out - ref)))
    assert jnp.allclose(out, ref, atol=3e-2, rtol=3e-2), f"max abs err {err}"
    print("KERNEL_OK")
</pallas_src>

<mosaic_0001>
module attributes {stable_mosaic.version = 11 : i64} {
  func.func @_patch_embed_kernel(%arg0: i32, %arg1: memref<32x48xf32, #tpu.memory_space<vmem>>, %arg2: memref<48x32xbf16, #tpu.memory_space<vmem>>, %arg3: memref<1x32xf32, #tpu.memory_space<vmem>>, %arg4: memref<32x32xf32, #tpu.memory_space<vmem>>) attributes {dimension_semantics = [#tpu.dimension_semantics<parallel>], iteration_bounds = array<i64: 1>, scalar_prefetch = 0 : i64, scratch_operands = 0 : i64, tpu.core_type = #tpu.core_type<tc>, window_params = [{transform_indices = @transform_0, window_bounds = array<i64: 32, 48>}, {pipeline_mode = #tpu.pipeline_mode<synchronous>, transform_indices = @transform_1, window_bounds = array<i64: 48, 32>}, {pipeline_mode = #tpu.pipeline_mode<synchronous>, transform_indices = @transform_2, window_bounds = array<i64: 1, 32>}, {transform_indices = @transform_3, window_bounds = array<i64: 32, 32>}]} {
    %c0 = arith.constant 0 : index
    %c0_0 = arith.constant 0 : index
    %0 = vector.load %arg1[%c0, %c0_0] : memref<32x48xf32, #tpu.memory_space<vmem>>, vector<32x48xf32>
    %1 = arith.truncf %0 : vector<32x48xf32> to vector<32x48xbf16>
    %c0_1 = arith.constant 0 : index
    %c0_2 = arith.constant 0 : index
    %2 = vector.load %arg2[%c0_1, %c0_2] : memref<48x32xbf16, #tpu.memory_space<vmem>>, vector<48x32xbf16>
    %cst = arith.constant dense<0.000000e+00> : vector<32x32xf32>
    %3 = tpu.matmul %1, %2, %cst {dimension_numbers = #tpu.dot_dimension_numbers<[1], [0], [0], [1], [0, 0, 1, 1], [], []>} : vector<32x48xbf16>, vector<48x32xbf16>, vector<32x32xf32> -> vector<32x32xf32>
    %c0_3 = arith.constant 0 : index
    %c0_4 = arith.constant 0 : index
    %4 = vector.load %arg3[%c0_3, %c0_4] : memref<1x32xf32, #tpu.memory_space<vmem>>, vector<1x32xf32>
    %5 = vector.broadcast %4 : vector<1x32xf32> to vector<32x32xf32>
    %6 = arith.addf %3, %5 : vector<32x32xf32>
    %c0_5 = arith.constant 0 : index
    %c0_6 = arith.constant 0 : index
    %7 = vector.load %arg4[%c0_5, %c0_6] : memref<32x32xf32, #tpu.memory_space<vmem>>, vector<32x32xf32>
    tpu.vector_store %arg4[%c0_5, %c0_6], %6 {strides = array<i32>} : memref<32x32xf32, #tpu.memory_space<vmem>>, vector<32x32xf32>,
    return
  }
  func.func @transform_0(%arg0: i32) -> (i32, i32) {
    %c0_i32 = arith.constant 0 : i32
    %c0_i32_0 = arith.constant 0 : i32
    return %arg0, %c0_i32 : i32, i32
  }
  func.func @transform_1(%arg0: i32) -> (i32, i32) {
    %c0_i32 = arith.constant 0 : i32
    %c0_i32_0 = arith.constant 0 : i32
    %c0_i32_1 = arith.constant 0 : i32
    return %c0_i32, %c0_i32_0 : i32, i32
  }
  func.func @transform_2(%arg0: i32) -> (i32, i32) {
    %c0_i32 = arith.constant 0 : i32
    %c0_i32_0 = arith.constant 0 : i32
    %c0_i32_1 = arith.constant 0 : i32
    return %c0_i32, %c0_i32_0 : i32, i32
  }
  func.func @transform_3(%arg0: i32) -> (i32, i32) {
    %c0_i32 = arith.constant 0 : i32
    %c0_i32_0 = arith.constant 0 : i32
    return %arg0, %c0_i32 : i32, i32
  }
}

module attributes {stable_mosaic.version = 11 : i64} {
  func.func @_encoder_kernel(%arg0: i32, %arg1: i32, %arg2: memref<1x17x32xf32, #tpu.memory_space<vmem>>, %arg3: memref<1x17x32xf32, #tpu.memory_space<vmem>>, %arg4: memref<1x1x32xf32, #tpu.memory_space<vmem>>, %arg5: memref<1x1x32xf32, #tpu.memory_space<vmem>>, %arg6: memref<1x32x96xbf16, #tpu.memory_space<vmem>>, %arg7: memref<1x1x96xf32, #tpu.memory_space<vmem>>, %arg8: memref<1x32x32xbf16, #tpu.memory_space<vmem>>, %arg9: memref<1x1x32xf32, #tpu.memory_space<vmem>>, %arg10: memref<1x1x32xf32, #tpu.memory_space<vmem>>, %arg11: memref<1x1x32xf32, #tpu.memory_space<vmem>>, %arg12: memref<1x32x64xbf16, #tpu.memory_space<vmem>>, %arg13: memref<1x1x64xf32, #tpu.memory_space<vmem>>, %arg14: memref<1x64x32xbf16, #tpu.memory_space<vmem>>, %arg15: memref<1x1x32xf32, #tpu.memory_space<vmem>>, %arg16: memref<1x32xf32, #tpu.memory_space<vmem>>, %arg17: memref<1x32xf32, #tpu.memory_space<vmem>>, %arg18: memref<1x1x32xf32, #tpu.memory_space<vmem>>, %arg19: memref<1x17x32xf32, #tpu.memory_space<vmem>>) attributes {dimension_semantics = [#tpu.dimension_semantics<parallel>, #tpu.dimension_semantics<arbitrary>], iteration_bounds = array<i64: 2, 2>, scalar_prefetch = 0 : i64, scratch_operands = 1 : i64, tpu.core_type = #tpu.core_type<tc>, window_params = [{transform_indices = @transform_0, window_bounds = array<i64: 1, 17, 32>}, {pipeline_mode = #tpu.pipeline_mode<synchronous>, transform_indices = @transform_1, window_bounds = array<i64: 1, 17, 32>}, {transform_indices = @transform_2, window_bounds = array<i64: 1, 1, 32>}, {transform_indices = @transform_3, window_bounds = array<i64: 1, 1, 32>}, {transform_indices = @transform_4, window_bounds = array<i64: 1, 32, 96>}, {transform_indices = @transform_5, window_bounds = array<i64: 1, 1, 96>}, {transform_indices = @transform_6, window_bounds = array<i64: 1, 32, 32>}, {transform_indices = @transform_7, window_bounds = array<i64: 1, 1, 32>}, {transform_indices = @transform_8, window_bounds = array<i64: 1, 1, 32>}, {transform_indices = @transform_9, window_bounds = array<i64: 1, 1, 32>}, {transform_indices = @transform_10, window_bounds = array<i64: 1, 32, 64>}, {transform_indices = @transform_11, window_bounds = array<i64: 1, 1, 64>}, {transform_indices = @transform_12, window_bounds = array<i64: 1, 64, 32>}, {transform_indices = @transform_13, window_bounds = array<i64: 1, 1, 32>}, {pipeline_mode = #tpu.pipeline_mode<synchronous>, transform_indices = @transform_14, window_bounds = array<i64: 1, 32>}, {pipeline_mode = #tpu.pipeline_mode<synchronous>, transform_indices = @transform_15, window_bounds = array<i64: 1, 32>}, {transform_indices = @transform_16, window_bounds = array<i64: 1, 1, 32>}]} {
    %c0_i32 = arith.constant 0 : i32
    %0 = arith.cmpi eq, %arg1, %c0_i32 : i32
    %1 = arith.extui %0 : i1 to i32
    %c0_i32_0 = arith.constant 0 : i32
    %2 = arith.cmpi ne, %1, %c0_i32_0 : i32
    scf.if %2 {
      %c0_91 = arith.constant 0 : index
      %c0_92 = arith.constant 0 : index
      %c0_93 = arith.constant 0 : index
      %229 = vector.load %arg2[%c0_91, %c0_92, %c0_93] : memref<1x17x32xf32, #tpu.memory_space<vmem>>, vector<1x17x32xf32>
      %c0_94 = arith.constant 0 : index
      %c0_95 = arith.constant 0 : index
      %c0_96 = arith.constant 0 : index
      %230 = vector.load %arg3[%c0_94, %c0_95, %c0_96] : memref<1x17x32xf32, #tpu.memory_space<vmem>>, vector<1x17x32xf32>
      %231 = arith.addf %229, %230 : vector<1x17x32xf32>
      %c0_97 = arith.constant 0 : index
      %c0_98 = arith.constant 0 : index
      %c0_99 = arith.constant 0 : index
      %232 = vector.load %arg19[%c0_97, %c0_98, %c0_99] : memref<1x17x32xf32, #tpu.memory_space<vmem>>, vector<1x17x32xf32>
      tpu.vector_store %arg19[%c0_97, %c0_98, %c0_99], %231 {strides = array<i32>} : memref<1x17x32xf32, #tpu.memory_space<vmem>>, vector<1x17x32xf32>,
    } else {
    }
    %c0 = arith.constant 0 : index
    %c0_1 = arith.constant 0 : index
    %c0_2 = arith.constant 0 : index
    %3 = vector.load %arg19[%c0, %c0_1, %c0_2] : memref<1x17x32xf32, #tpu.memory_space<vmem>>, vector<1x17x32xf32>
    %c0_3 = arith.constant 0 : index
    %c0_4 = arith.constant 0 : index
    %c0_5 = arith.constant 0 : index
    %4 = vector.load %arg4[%c0_3, %c0_4, %c0_5] : memref<1x1x32xf32, #tpu.memory_space<vmem>>, vector<1x1x32xf32>
    %5 = vector.shape_cast %4 : vector<1x1x32xf32> to vector<1x32xf32>
    %c0_6 = arith.constant 0 : index
    %c0_7 = arith.constant 0 : index
    %c0_8 = arith.constant 0 : index
    %6 = vector.load %arg5[%c0_6, %c0_7, %c0_8] : memref<1x1x32xf32, #tpu.memory_space<vmem>>, vector<1x1x32xf32>
    %7 = vector.shape_cast %6 : vector<1x1x32xf32> to vector<1x32xf32>
    %cst = arith.constant dense<0.000000e+00> : vector<1x17xf32>
    %8 = vector.multi_reduction <add>, %3, %cst [2] : vector<1x17x32xf32> to vector<1x17xf32>
    %9 = vector.shape_cast %8 : vector<1x17xf32> to vector<1x17x1xf32>
    %cst_9 = arith.constant 3.200000e+01 : f32
    %10 = vector.broadcast %cst_9 : f32 to vector<1x17x1xf32>
    %11 = arith.divf %9, %10 : vector<1x17x1xf32>
    %12 = vector.broadcast %11 : vector<1x17x1xf32> to vector<1x17x32xf32>
    %13 = arith.subf %3, %12 : vector<1x17x32xf32>
    %14 = arith.mulf %13, %13 : vector<1x17x32xf32>
    %cst_10 = arith.constant dense<0.000000e+00> : vector<1x17xf32>
    %15 = vector.multi_reduction <add>, %14, %cst_10 [2] : vector<1x17x32xf32> to vector<1x17xf32>
    %16 = vector.shape_cast %15 : vector<1x17xf32> to vector<1x17x1xf32>
    %cst_11 = arith.constant 3.200000e+01 : f32
    %17 = vector.broadcast %cst_11 : f32 to vector<1x17x1xf32>
    %18 = arith.divf %16, %17 : vector<1x17x1xf32>
    %19 = vector.broadcast %11 : vector<1x17x1xf32> to vector<1x17x32xf32>
    %20 = arith.subf %3, %19 : vector<1x17x32xf32>
    %cst_12 = arith.constant 9.99999997E-7 : f32
    %21 = vector.broadcast %cst_12 : f32 to vector<1x17x1xf32>
    %22 = arith.addf %18, %21 : vector<1x17x1xf32>
    %23 = math.rsqrt %22 : vector<1x17x1xf32>
    %24 = vector.broadcast %23 : vector<1x17x1xf32> to vector<1x17x32xf32>
    %25 = arith.mulf %20, %24 : vector<1x17x32xf32>
    %26 = vector.shape_cast %5 : vector<1x32xf32> to vector<1x1x32xf32>
    %27 = vector.broadcast %26 : vector<1x1x32xf32> to vector<1x17x32xf32>
    %28 = arith.mulf %25, %27 : vector<1x17x32xf32>
    %29 = vector.shape_cast %7 : vector<1x32xf32> to vector<1x1x32xf32>
    %30 = vector.broadcast %29 : vector<1x1x32xf32> to vector<1x17x32xf32>
    %31 = arith.addf %28, %30 : vector<1x17x32xf32>
    %32 = vector.shape_cast %31 : vector<1x17x32xf32> to vector<17x32xf32>
    %33 = arith.truncf %32 : vector<17x32xf32> to vector<17x32xbf16>
    %c0_13 = arith.constant 0 : index
    %c0_14 = arith.constant 0 : index
    %c0_15 = arith.constant 0 : index
    %34 = vector.load %arg6[%c0_13, %c0_14, %c0_15] : memref<1x32x96xbf16, #tpu.memory_space<vmem>>, vector<1x32x96xbf16>
    %35 = vector.shape_cast %34 : vector<1x32x96xbf16> to vector<32x96xbf16>
    %cst_16 = arith.constant dense<0.000000e+00> : vector<17x96xf32>
    %36 = tpu.matmul %33, %35, %cst_16 {dimension_numbers = #tpu.dot_dimension_numbers<[1], [0], [0], [1], [0, 0, 1, 1], [], []>} : vector<17x32xbf16>, vector<32x96xbf16>, vector<17x96xf32> -> vector<17x96xf32>
    %c0_17 = arith.constant 0 : index
    %c0_18 = arith.constant 0 : index
    %c0_19 = arith.constant 0 : index
    %37 = vector.load %arg7[%c0_17, %c0_18, %c0_19] : memref<1x1x96xf32, #tpu.memory_space<vmem>>, vector<1x1x96xf32>
    %38 = vector.shape_cast %37 : vector<1x1x96xf32> to vector<1x96xf32>
    %39 = vector.broadcast %38 : vector<1x96xf32> to vector<17x96xf32>
    %40 = arith.addf %36, %39 : vector<17x96xf32>
    %41 = vector.shape_cast %40 : vector<17x96xf32> to vector<1x17x96xf32>
    %42 = vector.extract_strided_slice %41 {offsets = [0, 0, 0], sizes = [1, 17, 8], strides = [1, 1, 1]} : vector<1x17x96xf32> to vector<1x17x8xf32>
    %43 = arith.truncf %42 : vector<1x17x8xf32> to vector<1x17x8xbf16>
    %44 = vector.extract_strided_slice %41 {offsets = [0, 0, 32], sizes = [1, 17, 8], strides = [1, 1, 1]} : vector<1x17x96xf32> to vector<1x17x8xf32>
    %45 = arith.truncf %44 : vector<1x17x8xf32> to vector<1x17x8xbf16>
    %46 = vector.extract_strided_slice %41 {offsets = [0, 0, 64], sizes = [1, 17, 8], strides = [1, 1, 1]} : vector<1x17x96xf32> to vector<1x17x8xf32>
    %47 = arith.truncf %46 : vector<1x17x8xf32> to vector<1x17x8xbf16>
    "tpu.trace_start"() <{level = 10 : i32, message = "bqd,bkd->bqk"}> : () -> ()
    %cst_20 = arith.constant dense<0.000000e+00> : vector<1x17x17xf32>
    %48 = tpu.matmul %43, %45, %cst_20 {dimension_numbers = #tpu.dot_dimension_numbers<[2], [2], [1], [1], [0, 0, 0, 1, 1, 1], [0], [0]>} : vector<1x17x8xbf16>, vector<1x17x8xbf16>, vector<1x17x17xf32> -> vector<1x17x17xf32>
    "tpu.trace_stop"() : () -> ()
    %cst_21 = arith.constant 0.353553385 : f32
    %49 = vector.broadcast %cst_21 : f32 to vector<1x17x17xf32>
    %50 = arith.mulf %48, %49 : vector<1x17x17xf32>
    %cst_22 = arith.constant dense<0xFF800000> : vector<1x17xf32>
    %51 = vector.multi_reduction <maximumf>, %50, %cst_22 [2] : vector<1x17x17xf32> to vector<1x17xf32>
    %52 = vector.shape_cast %51 : vector<1x17xf32> to vector<1x17x1xf32>
    %53 = vector.broadcast %52 : vector<1x17x1xf32> to vector<1x17x17xf32>
    %54 = arith.subf %50, %53 : vector<1x17x17xf32>
    %55 = math.exp %54 : vector<1x17x17xf32>
    %cst_23 = arith.constant dense<0.000000e+00> : vector<1x17xf32>
    %56 = vector.multi_reduction <add>, %55, %cst_23 [2] : vector<1x17x17xf32> to vector<1x17xf32>
    %57 = vector.shape_cast %56 : vector<1x17xf32> to vector<1x17x1xf32>
    %58 = tpu.reciprocal %57 {approx = true} : vector<1x17x1xf32> -> vector<1x17x1xf32>
    %59 = vector.broadcast %58 : vector<1x17x1xf32> to vector<1x17x17xf32>
    %60 = arith.mulf %55, %59 : vector<1x17x17xf32>
    %61 = arith.truncf %60 : vector<1x17x17xf32> to vector<1x17x17xbf16>
    "tpu.trace_start"() <{level = 10 : i32, message = "bqk,bkd->bqd"}> : () -> ()
    %cst_24 = arith.constant dense<0.000000e+00> : vector<1x17x8xf32>
    %62 = tpu.matmul %61, %47, %cst_24 {dimension_numbers = #tpu.dot_dimension_numbers<[2], [1], [1], [2], [0, 0, 0, 1, 1, 2], [0], [0]>} : vector<1x17x17xbf16>, vector<1x17x8xbf16>, vector<1x17x8xf32> -> vector<1x17x8xf32>
    "tpu.trace_stop"() : () -> ()
    %63 = vector.extract_strided_slice %41 {offsets = [0, 0, 8], sizes = [1, 17, 8], strides = [1, 1, 1]} : vector<1x17x96xf32> to vector<1x17x8xf32>
    %64 = arith.truncf %63 : vector<1x17x8xf32> to vector<1x17x8xbf16>
    %65 = vector.extract_strided_slice %41 {offsets = [0, 0, 40], sizes = [1, 17, 8], strides = [1, 1, 1]} : vector<1x17x96xf32> to vector<1x17x8xf32>
    %66 = arith.truncf %65 : vector<1x17x8xf32> to vector<1x17x8xbf16>
    %67 = vector.extract_strided_slice %41 {offsets = [0, 0, 72], sizes = [1, 17, 8], strides = [1, 1, 1]} : vector<1x17x96xf32> to vector<1x17x8xf32>
    %68 = arith.truncf %67 : vector<1x17x8xf32> to vector<1x17x8xbf16>
    "tpu.trace_start"() <{level = 10 : i32, message = "bqd,bkd->bqk"}> : () -> ()
    %cst_25 = arith.constant dense<0.000000e+00> : vector<1x17x17xf32>
    %69 = tpu.matmul %64, %66, %cst_25 {dimension_numbers = #tpu.dot_dimension_numbers<[2], [2], [1], [1], [0, 0, 0, 1, 1, 1], [0], [0]>} : vector<1x17x8xbf16>, vector<1x17x8xbf16>, vector<1x17x17xf32> -> vector<1x17x17xf32>
    "tpu.trace_stop"() : () -> ()
    %cst_26 = arith.constant 0.353553385 : f32
    %70 = vector.broadcast %cst_26 : f32 to vector<1x17x17xf32>
    %71 = arith.mulf %69, %70 : vector<1x17x17xf32>
    %cst_27 = arith.constant dense<0xFF800000> : vector<1x17xf32>
    %72 = vector.multi_reduction <maximumf>, %71, %cst_27 [2] : vector<1x17x17xf32> to vector<1x17xf32>
    %73 = vector.shape_cast %72 : vector<1x17xf32> to vector<1x17x1xf32>
    %74 = vector.broadcast %73 : vector<1x17x1xf32> to vector<1x17x17xf32>
    %75 = arith.subf %71, %74 : vector<1x17x17xf32>
    %76 = math.exp %75 : vector<1x17x17xf32>
    %cst_28 = arith.constant dense<0.000000e+00> : vector<1x17xf32>
    %77 = vector.multi_reduction <add>, %76, %cst_28 [2] : vector<1x17x17xf32> to vector<1x17xf32>
    %78 = vector.shape_cast %77 : vector<1x17xf32> to vector<1x17x1xf32>
    %79 = tpu.reciprocal %78 {approx = true} : vector<1x17x1xf32> -> vector<1x17x1xf32>
    %80 = vector.broadcast %79 : vector<1x17x1xf32> to vector<1x17x17xf32>
    %81 = arith.mulf %76, %80 : vector<1x17x17xf32>
    %82 = arith.truncf %81 : vector<1x17x17xf32> to vector<1x17x17xbf16>
    "tpu.trace_start"() <{level = 10 : i32, message = "bqk,bkd->bqd"}> : () -> ()
    %cst_29 = arith.constant dense<0.000000e+00> : vector<1x17x8xf32>
    %83 = tpu.matmul %82, %68, %cst_29 {dimension_numbers = #tpu.dot_dimension_numbers<[2], [1], [1], [2], [0, 0, 0, 1, 1, 2], [0], [0]>} : vector<1x17x17xbf16>, vector<1x17x8xbf16>, vector<1x17x8xf32> -> vector<1x17x8xf32>
    "tpu.trace_stop"() : () -> ()
    %84 = vector.extract_strided_slice %41 {offsets = [0, 0, 16], sizes = [1, 17, 8], strides = [1, 1, 1]} : vector<1x17x96xf32> to vector<1x17x8xf32>
    %85 = arith.truncf %84 : vector<1x17x8xf32> to vector<1x17x8xbf16>
    %86 = vector.extract_strided_slice %41 {offsets = [0, 0, 48], sizes = [1, 17, 8], strides = [1, 1, 1]} : vector<1x17x96xf32> to vector<1x17x8xf32>
    %87 = arith.truncf %86 : vector<1x17x8xf32> to vector<1x17x8xbf16>
    %88 = vector.extract_strided_slice %41 {offsets = [0, 0, 80], sizes = [1, 17, 8], strides = [1, 1, 1]} : vector<1x17x96xf32> to vector<1x17x8xf32>
    %89 = arith.truncf %88 : vector<1x17x8xf32> to vector<1x17x8xbf16>
    "tpu.trace_start"() <{level = 10 : i32, message = "bqd,bkd->bqk"}> : () -> ()
    %cst_30 = arith.constant dense<0.000000e+00> : vector<1x17x17xf32>
    %90 = tpu.matmul %85, %87, %cst_30 {dimension_numbers = #tpu.dot_dimension_numbers<[2], [2], [1], [1], [0, 0, 0, 1, 1, 1], [0], [0]>} : vector<1x17x8xbf16>, vector<1x17x8xbf16>, vector<1x17x17xf32> -> vector<1x17x17xf32>
    "tpu.trace_stop"() : () -> ()
    %cst_31 = arith.constant 0.353553385 : f32
    %91 = vector.broadcast %cst_31 : f32 to vector<1x17x17xf32>
    %92 = arith.mulf %90, %91 : vector<1x17x17xf32>
    %cst_32 = arith.constant dense<0xFF800000> : vector<1x17xf32>
    %93 = vector.multi_reduction <maximumf>, %92, %cst_32 [2] : vector<1x17x17xf32> to vector<1x17xf32>
    %94 = vector.shape_cast %93 : vector<1x17xf32> to vector<1x17x1xf32>
    %95 = vector.broadcast %94 : vector<1x17x1xf32> to vector<1x17x17xf32>
    %96 = arith.subf %92, %95 : vector<1x17x17xf32>
    %97 = math.exp %96 : vector<1x17x17xf32>
    %cst_33 = arith.constant dense<0.000000e+00> : vector<1x17xf32>
    %98 = vector.multi_reduction <add>, %97, %cst_33 [2] : vector<1x17x17xf32> to vector<1x17xf32>
    %99 = vector.shape_cast %98 : vector<1x17xf32> to vector<1x17x1xf32>
    %100 = tpu.reciprocal %99 {approx = true} : vector<1x17x1xf32> -> vector<1x17x1xf32>
    %101 = vector.broadcast %100 : vector<1x17x1xf32> to vector<1x17x17xf32>
    %102 = arith.mulf %97, %101 : vector<1x17x17xf32>
    %103 = arith.truncf %102 : vector<1x17x17xf32> to vector<1x17x17xbf16>
    "tpu.trace_start"() <{level = 10 : i32, message = "bqk,bkd->bqd"}> : () -> ()
    %cst_34 = arith.constant dense<0.000000e+00> : vector<1x17x8xf32>
    %104 = tpu.matmul %103, %89, %cst_34 {dimension_numbers = #tpu.dot_dimension_numbers<[2], [1], [1], [2], [0, 0, 0, 1, 1, 2], [0], [0]>} : vector<1x17x17xbf16>, vector<1x17x8xbf16>, vector<1x17x8xf32> -> vector<1x17x8xf32>
    "tpu.trace_stop"() : () -> ()
    %105 = vector.extract_strided_slice %41 {offsets = [0, 0, 24], sizes = [1, 17, 8], strides = [1, 1, 1]} : vector<1x17x96xf32> to vector<1x17x8xf32>
    %106 = arith.truncf %105 : vector<1x17x8xf32> to vector<1x17x8xbf16>
    %107 = vector.extract_strided_slice %41 {offsets = [0, 0, 56], sizes = [1, 17, 8], strides = [1, 1, 1]} : vector<1x17x96xf32> to vector<1x17x8xf32>
    %108 = arith.truncf %107 : vector<1x17x8xf32> to vector<1x17x8xbf16>
    %109 = vector.extract_strided_slice %41 {offsets = [0, 0, 88], sizes = [1, 17, 8], strides = [1, 1, 1]} : vector<1x17x96xf32> to vector<1x17x8xf32>
    %110 = arith.truncf %109 : vector<1x17x8xf32> to vector<1x17x8xbf16>
    "tpu.trace_start"() <{level = 10 : i32, message = "bqd,bkd->bqk"}> : () -> ()
    %cst_35 = arith.constant dense<0.000000e+00> : vector<1x17x17xf32>
    %111 = tpu.matmul %106, %108, %cst_35 {dimension_numbers = #tpu.dot_dimension_numbers<[2], [2], [1], [1], [0, 0, 0, 1, 1, 1], [0], [0]>} : vector<1x17x8xbf16>, vector<1x17x8xbf16>, vector<1x17x17xf32> -> vector<1x17x17xf32>
    "tpu.trace_stop"() : () -> ()
    %cst_36 = arith.constant 0.353553385 : f32
    %112 = vector.broadcast %cst_36 : f32 to vector<1x17x17xf32>
    %113 = arith.mulf %111, %112 : vector<1x17x17xf32>
    %cst_37 = arith.constant dense<0xFF800000> : vector<1x17xf32>
    %114 = vector.multi_reduction <maximumf>, %113, %cst_37 [2] : vector<1x17x17xf32> to vector<1x17xf32>
    %115 = vector.shape_cast %114 : vector<1x17xf32> to vector<1x17x1xf32>
    %116 = vector.broadcast %115 : vector<1x17x1xf32> to vector<1x17x17xf32>
    %117 = arith.subf %113, %116 : vector<1x17x17xf32>
    %118 = math.exp %117 : vector<1x17x17xf32>
    %cst_38 = arith.constant dense<0.000000e+00> : vector<1x17xf32>
    %119 = vector.multi_reduction <add>, %118, %cst_38 [2] : vector<1x17x17xf32> to vector<1x17xf32>
    %120 = vector.shape_cast %119 : vector<1x17xf32> to vector<1x17x1xf32>
    %121 = tpu.reciprocal %120 {approx = true} : vector<1x17x1xf32> -> vector<1x17x1xf32>
    %122 = vector.broadcast %121 : vector<1x17x1xf32> to vector<1x17x17xf32>
    %123 = arith.mulf %118, %122 : vector<1x17x17xf32>
    %124 = arith.truncf %123 : vector<1x17x17xf32> to vector<1x17x17xbf16>
    "tpu.trace_start"() <{level = 10 : i32, message = "bqk,bkd->bqd"}> : () -> ()
    %cst_39 = arith.constant dense<0.000000e+00> : vector<1x17x8xf32>
    %125 = tpu.matmul %124, %110, %cst_39 {dimension_numbers = #tpu.dot_dimension_numbers<[2], [1], [1], [2], [0, 0, 0, 1, 1, 2], [0], [0]>} : vector<1x17x17xbf16>, vector<1x17x8xbf16>, vector<1x17x8xf32> -> vector<1x17x8xf32>
    "tpu.trace_stop"() : () -> ()
    %126 = tpu.concatenate %62, %83, %104, %125 in 2 : vector<1x17x8xf32>, vector<1x17x8xf32>, vector<1x17x8xf32>, vector<1x17x8xf32> -> vector<1x17x32xf32>
    %127 = vector.shape_cast %126 : vector<1x17x32xf32> to vector<17x32xf32>
    %128 = arith.truncf %127 : vector<17x32xf32> to vector<17x32xbf16>
    %c0_40 = arith.constant 0 : index
    %c0_41 = arith.constant 0 : index
    %c0_42 = arith.constant 0 : index
    %129 = vector.load %arg8[%c0_40, %c0_41, %c0_42] : memref<1x32x32xbf16, #tpu.memory_space<vmem>>, vector<1x32x32xbf16>
    %130 = vector.shape_cast %129 : vector<1x32x32xbf16> to vector<32x32xbf16>
    %cst_43 = arith.constant dense<0.000000e+00> : vector<17x32xf32>
    %131 = tpu.matmul %128, %130, %cst_43 {dimension_numbers = #tpu.dot_dimension_numbers<[1], [0], [0], [1], [0, 0, 1, 1], [], []>} : vector<17x32xbf16>, vector<32x32xbf16>, vector<17x32xf32> -> vector<17x32xf32>
    %c0_44 = arith.constant 0 : index
    %c0_45 = arith.constant 0 : index
    %c0_46 = arith.constant 0 : index
    %132 = vector.load %arg9[%c0_44, %c0_45, %c0_46] : memref<1x1x32xf32, #tpu.memory_space<vmem>>, vector<1x1x32xf32>
    %133 = vector.shape_cast %132 : vector<1x1x32xf32> to vector<1x32xf32>
    %134 = vector.broadcast %133 : vector<1x32xf32> to vector<17x32xf32>
    %135 = arith.addf %131, %134 : vector<17x32xf32>
    %136 = vector.shape_cast %135 : vector<17x32xf32> to vector<1x17x32xf32>
    %137 = arith.addf %3, %136 : vector<1x17x32xf32>
    %c0_47 = arith.constant 0 : index
    %c0_48 = arith.constant 0 : index
    %c0_49 = arith.constant 0 : index
    %138 = vector.load %arg10[%c0_47, %c0_48, %c0_49] : memref<1x1x32xf32, #tpu.memory_space<vmem>>, vector<1x1x32xf32>
    %139 = vector.shape_cast %138 : vector<1x1x32xf32> to vector<1x32xf32>
    %c0_50 = arith.constant 0 : index
    %c0_51 = arith.constant 0 : index
    %c0_52 = arith.constant 0 : index
    %140 = vector.load %arg11[%c0_50, %c0_51, %c0_52] : memref<1x1x32xf32, #tpu.memory_space<vmem>>, vector<1x1x32xf32>
    %141 = vector.shape_cast %140 : vector<1x1x32xf32> to vector<1x32xf32>
    %cst_53 = arith.constant dense<0.000000e+00> : vector<1x17xf32>
    %142 = vector.multi_reduction <add>, %137, %cst_53 [2] : vector<1x17x32xf32> to vector<1x17xf32>
    %143 = vector.shape_cast %142 : vector<1x17xf32> to vector<1x17x1xf32>
    %cst_54 = arith.constant 3.200000e+01 : f32
    %144 = vector.broadcast %cst_54 : f32 to vector<1x17x1xf32>
    %145 = arith.divf %143, %144 : vector<1x17x1xf32>
    %146 = vector.broadcast %145 : vector<1x17x1xf32> to vector<1x17x32xf32>
    %147 = arith.subf %137, %146 : vector<1x17x32xf32>
    %148 = arith.mulf %147, %147 : vector<1x17x32xf32>
    %cst_55 = arith.constant dense<0.000000e+00> : vector<1x17xf32>
    %149 = vector.multi_reduction <add>, %148, %cst_55 [2] : vector<1x17x32xf32> to vector<1x17xf32>
    %150 = vector.shape_cast %149 : vector<1x17xf32> to vector<1x17x1xf32>
    %cst_56 = arith.constant 3.200000e+01 : f32
    %151 = vector.broadcast %cst_56 : f32 to vector<1x17x1xf32>
    %152 = arith.divf %150, %151 : vector<1x17x1xf32>
    %153 = vector.broadcast %145 : vector<1x17x1xf32> to vector<1x17x32xf32>
    %154 = arith.subf %137, %153 : vector<1x17x32xf32>
    %cst_57 = arith.constant 9.99999997E-7 : f32
    %155 = vector.broadcast %cst_57 : f32 to vector<1x17x1xf32>
    %156 = arith.addf %152, %155 : vector<1x17x1xf32>
    %157 = math.rsqrt %156 : vector<1x17x1xf32>
    %158 = vector.broadcast %157 : vector<1x17x1xf32> to vector<1x17x32xf32>
    %159 = arith.mulf %154, %158 : vector<1x17x32xf32>
    %160 = vector.shape_cast %139 : vector<1x32xf32> to vector<1x1x32xf32>
    %161 = vector.broadcast %160 : vector<1x1x32xf32> to vector<1x17x32xf32>
    %162 = arith.mulf %159, %161 : vector<1x17x32xf32>
    %163 = vector.shape_cast %141 : vector<1x32xf32> to vector<1x1x32xf32>
    %164 = vector.broadcast %163 : vector<1x1x32xf32> to vector<1x17x32xf32>
    %165 = arith.addf %162, %164 : vector<1x17x32xf32>
    %166 = vector.shape_cast %165 : vector<1x17x32xf32> to vector<17x32xf32>
    %167 = arith.truncf %166 : vector<17x32xf32> to vector<17x32xbf16>
    %c0_58 = arith.constant 0 : index
    %c0_59 = arith.constant 0 : index
    %c0_60 = arith.constant 0 : index
    %168 = vector.load %arg12[%c0_58, %c0_59, %c0_60] : memref<1x32x64xbf16, #tpu.memory_space<vmem>>, vector<1x32x64xbf16>
    %169 = vector.shape_cast %168 : vector<1x32x64xbf16> to vector<32x64xbf16>
    %cst_61 = arith.constant dense<0.000000e+00> : vector<17x64xf32>
    %170 = tpu.matmul %167, %169, %cst_61 {dimension_numbers = #tpu.dot_dimension_numbers<[1], [0], [0], [1], [0, 0, 1, 1], [], []>} : vector<17x32xbf16>, vector<32x64xbf16>, vector<17x64xf32> -> vector<17x64xf32>
    %c0_62 = arith.constant 0 : index
    %c0_63 = arith.constant 0 : index
    %c0_64 = arith.constant 0 : index
    %171 = vector.load %arg13[%c0_62, %c0_63, %c0_64] : memref<1x1x64xf32, #tpu.memory_space<vmem>>, vector<1x1x64xf32>
    %172 = vector.shape_cast %171 : vector<1x1x64xf32> to vector<1x64xf32>
    %173 = vector.broadcast %172 : vector<1x64xf32> to vector<17x64xf32>
    %174 = arith.addf %170, %173 : vector<17x64xf32>
    %cst_65 = arith.constant 5.000000e-01 : f32
    %175 = vector.broadcast %cst_65 : f32 to vector<17x64xf32>
    %176 = arith.mulf %175, %174 : vector<17x64xf32>
    %cst_66 = arith.constant 0.707106769 : f32
    %177 = vector.broadcast %cst_66 : f32 to vector<17x64xf32>
    %178 = arith.mulf %174, %177 : vector<17x64xf32>
    %179 = math.absf %178 : vector<17x64xf32>
    %cst_67 = arith.constant 0.327591091 : f32
    %180 = vector.broadcast %cst_67 : f32 to vector<17x64xf32>
    %181 = arith.mulf %180, %179 : vector<17x64xf32>
    %cst_68 = arith.constant 1.000000e+00 : f32
    %182 = vector.broadcast %cst_68 : f32 to vector<17x64xf32>
    %183 = arith.addf %182, %181 : vector<17x64xf32>
    %cst_69 = arith.constant 1.000000e+00 : f32
    %184 = vector.broadcast %cst_69 : f32 to vector<17x64xf32>
    %185 = arith.divf %184, %183 : vector<17x64xf32>
    %cst_70 = arith.constant 1.06140542 : f32
    %186 = vector.broadcast %cst_70 : f32 to vector<17x64xf32>
    %187 = arith.mulf %186, %185 : vector<17x64xf32>
    %cst_71 = arith.constant -1.45315206 : f32
    %188 = vector.broadcast %cst_71 : f32 to vector<17x64xf32>
    %189 = arith.addf %187, %188 : vector<17x64xf32>
    %190 = arith.mulf %189, %185 : vector<17x64xf32>
    %cst_72 = arith.constant 1.42141378 : f32
    %191 = vector.broadcast %cst_72 : f32 to vector<17x64xf32>
    %192 = arith.addf %190, %191 : vector<17x64xf32>
    %193 = arith.mulf %192, %185 : vector<17x64xf32>
    %cst_73 = arith.constant -0.284496725 : f32
    %194 = vector.broadcast %cst_73 : f32 to vector<17x64xf32>
    %195 = arith.addf %193, %194 : vector<17x64xf32>
    %196 = arith.mulf %195, %185 : vector<17x64xf32>
    %cst_74 = arith.constant 0.254829586 : f32
    %197 = vector.broadcast %cst_74 : f32 to vector<17x64xf32>
    %198 = arith.addf %196, %197 : vector<17x64xf32>
    %199 = arith.mulf %198, %185 : vector<17x64xf32>
    %cst_75 = arith.constant 0.000000e+00 : f32
    %200 = vector.broadcast %cst_75 : f32 to vector<17x64xf32>
    %201 = arith.subf %200, %179 : vector<17x64xf32>
    %202 = arith.mulf %201, %179 : vector<17x64xf32>
    %203 = math.exp %202 : vector<17x64xf32>
    %204 = arith.mulf %199, %203 : vector<17x64xf32>
    %cst_76 = arith.constant 1.000000e+00 : f32
    %205 = vector.broadcast %cst_76 : f32 to vector<17x64xf32>
    %206 = arith.subf %205, %204 : vector<17x64xf32>
    %cst_77 = arith.constant 0.000000e+00 : f32
    %207 = vector.broadcast %cst_77 : f32 to vector<17x64xf32>
    %208 = arith.cmpf oge, %178, %207 : vector<17x64xf32>
    %cst_78 = arith.constant 0.000000e+00 : f32
    %209 = vector.broadcast %cst_78 : f32 to vector<17x64xf32>
    %210 = arith.subf %209, %206 : vector<17x64xf32>
    %211 = arith.select %208, %206, %210 : vector<17x64xi1>, vector<17x64xf32>
    %cst_79 = arith.constant 1.000000e+00 : f32
    %212 = vector.broadcast %cst_79 : f32 to vector<17x64xf32>
    %213 = arith.addf %212, %211 : vector<17x64xf32>
    %214 = arith.mulf %176, %213 : vector<17x64xf32>
    %215 = arith.truncf %214 : vector<17x64xf32> to vector<17x64xbf16>
    %c0_80 = arith.constant 0 : index
    %c0_81 = arith.constant 0 : index
    %c0_82 = arith.constant 0 : index
    %216 = vector.load %arg14[%c0_80, %c0_81, %c0_82] : memref<1x64x32xbf16, #tpu.memory_space<vmem>>, vector<1x64x32xbf16>
    %217 = vector.shape_cast %216 : vector<1x64x32xbf16> to vector<64x32xbf16>
    %cst_83 = arith.constant dense<0.000000e+00> : vector<17x32xf32>
    %218 = tpu.matmul %215, %217, %cst_83 {dimension_numbers = #tpu.dot_dimension_numbers<[1], [0], [0], [1], [0, 0, 1, 1], [], []>} : vector<17x64xbf16>, vector<64x32xbf16>, vector<17x32xf32> -> vector<17x32xf32>
    %c0_84 = arith.constant 0 : index
    %c0_85 = arith.constant 0 : index
    %c0_86 = arith.constant 0 : index
    %219 = vector.load %arg15[%c0_84, %c0_85, %c0_86] : memref<1x1x32xf32, #tpu.memory_space<vmem>>, vector<1x1x32xf32>
    %220 = vector.shape_cast %219 : vector<1x1x32xf32> to vector<1x32xf32>
    %221 = vector.broadcast %220 : vector<1x32xf32> to vector<17x32xf32>
    %222 = arith.addf %218, %221 : vector<17x32xf32>
    %223 = vector.shape_cast %222 : vector<17x32xf32> to vector<1x17x32xf32>
    %224 = arith.addf %137, %223 : vector<1x17x32xf32>
    %c0_87 = arith.constant 0 : index
    %c0_88 = arith.constant 0 : index
    %c0_89 = arith.constant 0 : index
    %225 = vector.load %arg19[%c0_87, %c0_88, %c0_89] : memref<1x17x32xf32, #tpu.memory_space<vmem>>, vector<1x17x32xf32>
    tpu.vector_store %arg19[%c0_87, %c0_88, %c0_89], %224 {strides = array<i32>} : memref<1x17x32xf32, #tpu.memory_space<vmem>>, vector<1x17x32xf32>,
    %c1_i32 = arith.constant 1 : i32
    %226 = arith.cmpi eq, %arg1, %c1_i32 : i32
    %227 = arith.extui %226 : i1 to i32
    %c0_i32_90 = arith.constant 0 : i32
    %228 = arith.cmpi ne, %227, %c0_i32_90 : i32
    scf.if %228 {
      %229 = vector.extract_strided_slice %224 {offsets = [0, 0, 0], sizes = [1, 1, 32], strides = [1, 1, 1]} : vector<1x17x32xf32> to vector<1x1x32xf32>
      %c0_91 = arith.constant 0 : index
      %c0_92 = arith.constant 0 : index
      %230 = vector.load %arg16[%c0_91, %c0_92] : memref<1x32xf32, #tpu.memory_space<vmem>>, vector<1x32xf32>
      %c0_93 = arith.constant 0 : index
      %c0_94 = arith.constant 0 : index
      %231 = vector.load %arg17[%c0_93, %c0_94] : memref<1x32xf32, #tpu.memory_space<vmem>>, vector<1x32xf32>
      %cst_95 = arith.constant dense<0.000000e+00> : vector<1x1xf32>
      %232 = vector.multi_reduction <add>, %229, %cst_95 [2] : vector<1x1x32xf32> to vector<1x1xf32>
      %233 = vector.shape_cast %232 : vector<1x1xf32> to vector<1x1x1xf32>
      %cst_96 = arith.constant 3.200000e+01 : f32
      %234 = vector.broadcast %cst_96 : f32 to vector<1x1x1xf32>
      %235 = arith.divf %233, %234 : vector<1x1x1xf32>
      %236 = vector.broadcast %235 : vector<1x1x1xf32> to vector<1x1x32xf32>
      %237 = arith.subf %229, %236 : vector<1x1x32xf32>
      %238 = arith.mulf %237, %237 : vector<1x1x32xf32>
      %cst_97 = arith.constant dense<0.000000e+00> : vector<1x1xf32>
      %239 = vector.multi_reduction <add>, %238, %cst_97 [2] : vector<1x1x32xf32> to vector<1x1xf32>
      %240 = vector.shape_cast %239 : vector<1x1xf32> to vector<1x1x1xf32>
      %cst_98 = arith.constant 3.200000e+01 : f32
      %241 = vector.broadcast %cst_98 : f32 to vector<1x1x1xf32>
      %242 = arith.divf %240, %241 : vector<1x1x1xf32>
      %243 = vector.broadcast %235 : vector<1x1x1xf32> to vector<1x1x32xf32>
      %244 = arith.subf %229, %243 : vector<1x1x32xf32>
      %cst_99 = arith.constant 9.99999997E-7 : f32
      %245 = vector.broadcast %cst_99 : f32 to vector<1x1x1xf32>
      %246 = arith.addf %242, %245 : vector<1x1x1xf32>
      %247 = math.rsqrt %246 : vector<1x1x1xf32>
      %248 = vector.broadcast %247 : vector<1x1x1xf32> to vector<1x1x32xf32>
      %249 = arith.mulf %244, %248 : vector<1x1x32xf32>
      %250 = vector.shape_cast %230 : vector<1x32xf32> to vector<1x1x32xf32>
      %251 = arith.mulf %249, %250 : vector<1x1x32xf32>
      %252 = vector.shape_cast %231 : vector<1x32xf32> to vector<1x1x32xf32>
      %253 = arith.addf %251, %252 : vector<1x1x32xf32>
      %c0_100 = arith.constant 0 : index
      %c0_101 = arith.constant 0 : index
      %c0_102 = arith.constant 0 : index
      %254 = vector.load %arg18[%c0_100, %c0_101, %c0_102] : memref<1x1x32xf32, #tpu.memory_space<vmem>>, vector<1x1x32xf32>
      tpu.vector_store %arg18[%c0_100, %c0_101, %c0_102], %253 {strides = array<i32>} : memref<1x1x32xf32, #tpu.memory_space<vmem>>, vector<1x1x32xf32>,
    } else {
    }
    return
  }
  func.func @transform_0(%arg0: i32, %arg1: i32) -> (i32, i32, i32) {
    %c0_i32 = arith.constant 0 : i32
    %c0_i32_0 = arith.constant 0 : i32
    %c0_i32_1 = arith.constant 0 : i32
    return %arg0, %c0_i32, %c0_i32_0 : i32, i32, i32
  }
  func.func @transform_1(%arg0: i32, %arg1: i32) -> (i32, i32, i32) {
    %c0_i32 = arith.constant 0 : i32
    %c0_i32_0 = arith.constant 0 : i32
    %c0_i32_1 = arith.constant 0 : i32
    %c0_i32_2 = arith.constant 0 : i32
    return %c0_i32, %c0_i32_0, %c0_i32_1 : i32, i32, i32
  }
  func.func @transform_2(%arg0: i32, %arg1: i32) -> (i32, i32, i32) {
    %c0_i32 = arith.constant 0 : i32
    %c0_i32_0 = arith.constant 0 : i32
    %c0_i32_1 = arith.constant 0 : i32
    return %arg1, %c0_i32, %c0_i32_0 : i32, i32, i32
  }
  func.func @transform_3(%arg0: i32, %arg1: i32) -> (i32, i32, i32) {
    %c0_i32 = arith.constant 0 : i32
    %c0_i32_0 = arith.constant 0 : i32
    %c0_i32_1 = arith.constant 0 : i32
    return %arg1, %c0_i32, %c0_i32_0 : i32, i32, i32
  }
  func.func @transform_4(%arg0: i32, %arg1: i32) -> (i32, i32, i32) {
    %c0_i32 = arith.constant 0 : i32
    %c0_i32_0 = arith.constant 0 : i32
    %c0_i32_1 = arith.constant 0 : i32
    return %arg1, %c0_i32, %c0_i32_0 : i32, i32, i32
  }
  func.func @transform_5(%arg0: i32, %arg1: i32) -> (i32, i32, i32) {
    %c0_i32 = arith.constant 0 : i32
    %c0_i32_0 = arith.constant 0 : i32
    %c0_i32_1 = arith.constant 0 : i32
    return %arg1, %c0_i32, %c0_i32_0 : i32, i32, i32
  }
  func.func @transform_6(%arg0: i32, %arg1: i32) -> (i32, i32, i32) {
    %c0_i32 = arith.constant 0 : i32
    %c0_i32_0 = arith.constant 0 : i32
    %c0_i32_1 = arith.constant 0 : i32
    return %arg1, %c0_i32, %c0_i32_0 : i32, i32, i32
  }
  func.func @transform_7(%arg0: i32, %arg1: i32) -> (i32, i32, i32) {
    %c0_i32 = arith.constant 0 : i32
    %c0_i32_0 = arith.constant 0 : i32
    %c0_i32_1 = arith.constant 0 : i32
    return %arg1, %c0_i32, %c0_i32_0 : i32, i32, i32
  }
  func.func @transform_8(%arg0: i32, %arg1: i32) -> (i32, i32, i32) {
    %c0_i32 = arith.constant 0 : i32
    %c0_i32_0 = arith.constant 0 : i32
    %c0_i32_1 = arith.constant 0 : i32
    return %arg1, %c0_i32, %c0_i32_0 : i32, i32, i32
  }
  func.func @transform_9(%arg0: i32, %arg1: i32) -> (i32, i32, i32) {
    %c0_i32 = arith.constant 0 : i32
    %c0_i32_0 = arith.constant 0 : i32
    %c0_i32_1 = arith.constant 0 : i32
    return %arg1, %c0_i32, %c0_i32_0 : i32, i32, i32
  }
  func.func @transform_10(%arg0: i32, %arg1: i32) -> (i32, i32, i32) {
    %c0_i32 = arith.constant 0 : i32
    %c0_i32_0 = arith.constant 0 : i32
    %c0_i32_1 = arith.constant 0 : i32
    return %arg1, %c0_i32, %c0_i32_0 : i32, i32, i32
  }
  func.func @transform_11(%arg0: i32, %arg1: i32) -> (i32, i32, i32) {
    %c0_i32 = arith.constant 0 : i32
    %c0_i32_0 = arith.constant 0 : i32
    %c0_i32_1 = arith.constant 0 : i32
    return %arg1, %c0_i32, %c0_i32_0 : i32, i32, i32
  }
  func.func @transform_12(%arg0: i32, %arg1: i32) -> (i32, i32, i32) {
    %c0_i32 = arith.constant 0 : i32
    %c0_i32_0 = arith.constant 0 : i32
    %c0_i32_1 = arith.constant 0 : i32
    return %arg1, %c0_i32, %c0_i32_0 : i32, i32, i32
  }
  func.func @transform_13(%arg0: i32, %arg1: i32) -> (i32, i32, i32) {
    %c0_i32 = arith.constant 0 : i32
    %c0_i32_0 = arith.constant 0 : i32
    %c0_i32_1 = arith.constant 0 : i32
    return %arg1, %c0_i32, %c0_i32_0 : i32, i32, i32
  }
  func.func @transform_14(%arg0: i32, %arg1: i32) -> (i32, i32) {
    %c0_i32 = arith.constant 0 : i32
    %c0_i32_0 = arith.constant 0 : i32
    %c0_i32_1 = arith.constant 0 : i32
    return %c0_i32, %c0_i32_0 : i32, i32
  }
  func.func @transform_15(%arg0: i32, %arg1: i32) -> (i32, i32) {
    %c0_i32 = arith.constant 0 : i32
    %c0_i32_0 = arith.constant 0 : i32
    %c0_i32_1 = arith.constant 0 : i32
    return %c0_i32, %c0_i32_0 : i32, i32
  }
  func.func @transform_16(%arg0: i32, %arg1: i32) -> (i32, i32, i32) {
    %c0_i32 = arith.constant 0 : i32
    %c0_i32_0 = arith.constant 0 : i32
    %c0_i32_1 = arith.constant 0 : i32
    return %arg0, %c0_i32, %c0_i32_0 : i32, i32, i32
  }
}

</mosaic_0001>

<bundles_post_ra>
// kernel: transformer_forward.2
= control target key start
LH: loop header
LB: loop body
LE: loop exit
PB: predicated region body
PF: predicated region fallthrough
CT: control target
= control target key end

     0   :  { %vm52_vm0 = vcmask 392192   ;;  %vm108_vm1 = vcmask 261120   ;;  %s197_s1 = inlined_call_operand.vmem [shape: bf16[48,32], index: 1, kind: input, shape index: {}]   ;;  %s198_s0 = inlined_call_operand.vmem [shape: f32[32,48], index: 0, kind: input, shape index: {}]   ;;  %s199_s2 = inlined_call_operand.vmem [shape: f32[1,32], index: 2, kind: input, shape index: {}]   ;;  %s200_s3 = inlined_call_operand.vmem [shape: f32[32,32], index: 3, kind: output, shape index: {}]  }
   0x1   :  { %v138_v0 = vld [vmem:[%s197_s1 + $0x10] sm:$0xff]   ;;  %v139_v1 = vld [vmem:[%s197_s1 + $0x8] sm:$0xff]   ;;  %v15_v2 = vld [vmem:[%s198_s0] sm:$0xff] }
   0x2   :  { %128 = vmatprep.subr.bf16.mxu0 %v138_v0  ;;  %v16_v3 = vld [vmem:[%s198_s0 + $0x8] sm:$0xff]  ;;  %v140_v4 = vld [vmem:[%s197_s1] sm:$0xff]   ;;  %v17_v6 = vld [vmem:[%s198_s0 + $0x10] sm:$0xff] }
   0x3   :  { %129 = vmatpush3.bf16.msra.mxu0 %v138_v0  ;;  %v19_v5 = vpack.c.bf16 %v16_v3, %v15_v2  ;;  %v18_v7 = vld [vmem:[%s198_s0 + $0x18] sm:$0xff]  ;;  %v117_v9 = vld [vmem:[%s199_s2] ss:$0 sm:$0xff] }
   0x4   :  { %130 = vmatprep.subr.bf16.mxu0 %v139_v1  ;;  %v20_v8 = vpack.c.bf16 %v18_v7, %v17_v6 }
   0x5   :  { %134 = vmatprep.mubr.msk.bf16.mxu0 %vm52_vm0, %v19_v5 }
   0x7   :  { %131 = vmatpush3.bf16.msra.mxu0 %v139_v1 }
   0x8   :  { %132 = vmatprep.subr.bf16.mxu0 %v140_v4 }
   0xb   :  { %133 = vmatpush3.bf16.msra.mxu0 %v140_v4 }
   0xe   :  { %135 = vmatmul.mubr.msk.bf16.vlgmr.msra.gmra.mxu0 %vm52_vm0, %v20_v8 }
  0xce   :  { %v136_v10 = vpop.f32.mrf.mxu0 }
  0xcf   :  { %v102_v11 = vadd.f32 %v136_v10, %v117_v9 }
  0xd0   :  { %v93_v12 = vpop.f32.mrf.mxu0 }
  0xd1   :  { %111 = vst.msk [vmem:[%s200_s3 + $0x10] sm:$0xff] %vm108_vm1, %v102_v11  ;;  %v94_v13 = vadd.f32 %v117_v9, %v93_v12 }
  0xd2   :  { %v137_v14 = vpop.f32.mrf.mxu0 }
  0xd3   :  { %109 = vst.msk [vmem:[%s200_s3] sm:$0xff] %vm108_vm1, %v94_v13  ;;  %v105_v15 = vadd.f32 %v137_v14, %v117_v9 }
  0xd4   :  { %v96_v16 = vpop.f32.mrf.mxu0 }
  0xd5   :  { %112 = vst.msk [vmem:[%s200_s3 + $0x18] sm:$0xff] %vm108_vm1, %v105_v15  ;;  %v97_v17 = vadd.f32 %v117_v9, %v96_v16 }
  0xd7   :  { %110 = vst.msk [vmem:[%s200_s3 + $0x8] sm:$0xff] %vm108_vm1, %v97_v17 }

// kernel: transformer_forward.3
= control target key start
LH: loop header
LB: loop body
LE: loop exit
PB: predicated region body
PF: predicated region fallthrough
CT: control target
= control target key end

     0   :  { %s3283_s0 = inlined_call_operand.vmem [shape: f32[2,17,32], index: 0, kind: input, shape index: {}]   ;;  %s3284_s1 = inlined_call_operand.vmem [shape: f32[1,17,32], index: 1, kind: input, shape index: {}]   ;;  %s3285_s2 = inlined_call_operand.vmem [shape: f32[2,1,32], index: 2, kind: input, shape index: {}]   ;;  %s3286_s3 = inlined_call_operand.vmem [shape: f32[2,1,32], index: 3, kind: input, shape index: {}]   ;;  %s3287_s4 = inlined_call_operand.vmem [shape: bf16[2,32,96], index: 4, kind: input, shape index: {}]   ;;  %s3288_s5 = inlined_call_operand.vmem [shape: f32[2,1,96], index: 5, kind: input, shape index: {}]   ;;  %s3289_s6 = inlined_call_operand.vmem [shape: bf16[2,32,32], index: 6, kind: input, shape index: {}]   ;;  %s3290_s7 = inlined_call_operand.vmem [shape: f32[2,1,32], index: 7, kind: input, shape index: {}]   ;;  %s3291_s8 = inlined_call_operand.vmem [shape: f32[2,1,32], index: 8, kind: input, shape index: {}]   ;;  %s3292_s9 = inlined_call_operand.vmem [shape: f32[2,1,32], index: 9, kind: input, shape index: {}]   ;;  %s3293_s10 = inlined_call_operand.vmem [shape: bf16[2,32,64], index: 10, kind: input, shape index: {}]   ;;  %s3294_s11 = inlined_call_operand.vmem [shape: f32[2,1,64], index: 11, kind: input, shape index: {}]   ;;  %s3295_s12 = inlined_call_operand.vmem [shape: bf16[2,64,32], index: 12, kind: input, shape index: {}]   ;;  %s3296_s13 = inlined_call_operand.vmem [shape: f32[2,1,32], index: 13, kind: input, shape index: {}]   ;;  %s3297_s14 = inlined_call_operand.vmem [shape: f32[1,32], index: 14, kind: input, shape index: {}]   ;;  %s3298_s15 = inlined_call_operand.vmem [shape: f32[1,32], index: 15, kind: input, shape index: {}]   ;;  %s3299_s16 = inlined_call_operand.hbm [shape: f32[2,1,32], index: 16, kind: output, shape index: {}]  }
   0x1   :  { %3314 = sst [smem:[#allocation18_spill]] %s3283_s0 }
   0x2   :  { %3315 = sst [smem:[#allocation19_spill]] %s3284_s1 }
   0x3   :  { %3316 = sst [smem:[#allocation20_spill]] %s3285_s2 }
   0x4   :  { %3317 = sst [smem:[#allocation21_spill]] %s3287_s4 }
   0x5   :  { %3318 = sst [smem:[#allocation22_spill]] %s3289_s6 }
   0x6   :  { %3319 = sst [smem:[#allocation23_spill]] %s3297_s14 }
   0x7   :  { %3320 = sst [smem:[#allocation24_spill]] %s3298_s15 }
   0x8   :  { %3321 = sst [smem:[#allocation25_spill]] %s3299_s16 }
   0x9   :  { %21 = vsyncpa [#allocation4], 0 }
   0xa   :  { %23 = vsyncpa [#allocation4 + $0x1], 0  ;;  %s2839_s21 = smov 0   ;;  %s2841_s22 = smov 0  }
   0xb   :  { %s2843_s23 = smov 0   ;;  %s2845_s24 = smov 0  }
   0xc   :  { %s2847_s25 = smov 0   ;;  %s2849_s26 = smov 0  }
   0xd   :  { %s2851_s27 = smov 0   ;;  %s2853_s28 = smov 0  }
   0xe LB: > { %3322 = sst [smem:[#allocation6_spill]] %s2708_s21  ;;  %s2235_s29 = sadd.s32 4294967295, %s2736_s28   ;;  %s2736_s28 = sphi %s2853_s28, %s29_s28   ;;  %s2732_s27 = sphi %s2851_s27, %s3364_s27   ;;  %s2728_s26 = sphi %s2849_s26, %s3363_s26   ;;  %s2724_s25 = sphi %s2847_s25, %s3362_s25   ;;  %s2720_s24 = sphi %s2845_s24, %s3361_s24   ;;  %s2716_s23 = sphi %s2843_s23, %s3360_s23   ;;  %s2712_s22 = sphi %s2841_s22, %s3366_s22   ;;  %s2708_s21 = sphi %s2839_s21, %s3365_s21  }
   0xf   : > { %3323 = sst [smem:[#allocation7_spill]] %s2716_s23  ;;  %s2236_s30 = sadd.s32 4294967294, %s2736_s28  }
  0x10   : > { %3324 = sst [smem:[#allocation8_spill]] %s2720_s24  ;;  %s38_s0 = sadd.s32 1, %s2728_s26 }
  0x11   : > { %3325 = sst [smem:[#allocation9_spill]] %s2724_s25  ;;  %p39_p0 = scmp.ge.s32.totalorder %s38_s0, 2 }
  0x12   : > { %3326 = sst [smem:[#allocation10_spill]] %s2728_s26  ;;  %s41_s17 = sadd.s32 1, %s2732_s27 }
  0x13   : > { %3327 = sst [smem:[#allocation11_spill]] %s2732_s27  ;;  %p459_p1 = scmp.ne.s32.totalorder %s2716_s23, %s2712_s22 }
  0x14   : > { %3328 = sst [smem:[#allocation12_spill]] %s2736_s28  ;;  %p460_p2 = scmp.eq.s32.totalorder %s2235_s29, 3 }
  0x15   : > { %s3368_s0 = smov (%p39_p0, %s38_s0), 0  ;;  %s3370_s17 = smov (!%p39_p0, %s41_s17), %s2732_s27 }
  0x16   : > { %3329 = sst [smem:[#allocation13_spill]] %s3368_s0  ;;  %p2888_p3 = por %p460_p2, %p459_p1 }
  0x17   : > { %p465_p4 = scmp.ne.s32.totalorder %s2712_s22, %s2708_s21  ;;  %p43_p5 = scmp.ge.s32.totalorder %s3370_s17, 2 }
  0x18   : > { %s3330_s18 = scalar_select %p2888_p3, 1, 0 }
  0x19   : > { %p466_p6 = scmp.eq.s32.totalorder %s2236_s30, 3  ;;  %p2239_p7 = scmp.ge.s32.totalorder %s2736_s28, 1 }
  0x1a   : > { %3331 = sst [smem:[#allocation14_spill]] %s3330_s18  ;;  %p581_p8 = scmp.lt.s32.totalorder %s2736_s28, 5 }
  0x1b   : > { %s3372_s17 = smov (%p43_p5, %s3370_s17), 0  ;;  %p2898_p9 = por %p466_p6, %p465_p4 }
  0x1c   : > { %3332 = sst [smem:[#allocation15_spill]] %s3372_s17  ;;  %p582_p10 = pnand %p2239_p7, %p581_p8 }
  0x1d   : > { %s3333_s19 = scalar_select %p2898_p9, 1, 0 }
  0x1e   : > { %s446_s20 = ssub.s32 %s2732_s27, %s3372_s17  ;;  %s449_s29 = sadd.s32 1, %s2716_s23 }
  0x1f   : > { %3334 = sst [smem:[#allocation16_spill]] %s3333_s19  ;;  %p447_p11 = scmp.eq.s32.totalorder %s446_s20, 0 }
  0x20   : > { %585 = sbr.rel (%p582_p10) target bundleno = 4466 (0x1172), region = 84  ;;  %p674_p12 = scmp.lt.s32.totalorder (!%p582_p10), %s2724_s25, 1 }
  0x21   : > { %s2906_s0 = scalar_select %p447_p11, %s2716_s23, %s449_s29  }
  0x22   : > { %p679_p13 = scmp.lt.s32.totalorder (!%p582_p10), %s2720_s24, 1  ;;  %s3337_s16 = sld [smem:[#allocation18_spill]] (!%p582_p10) }
  0x23   : > { %3335 = sst [smem:[#allocation17_spill]] %s2906_s0  ;;  %s3340_s14 = sand.u32 (!%p582_p10), 1, %s2712_s22  }
  0x24   : > { %s3338_s4 = sld [smem:[#allocation21_spill]] (!%p582_p10)  ;;  %s2974_s15 = scalar_lea.vmem (!%p582_p10), [#allocation3], %s3340_s14 }
  0x25   : > { %s675_s26 = scalar_select %p674_p12, %s2724_s25, 1 }
  0x26   : > { %s2913_s21 = scalar_select %p679_p13, %s2720_s24, 1 }
  0x27   : > { %s2458_s20 = smul.u32 24, %s675_s26  ;;  %s3339_s6 = sld [smem:[#allocation22_spill]] }
  0x28   : > { %s2296_s25 = sshll.u32 %s2913_s21, 4  ;;  %s706_s23 = scalar_lea.vmem %s3292_s9, %s2913_s21 }
  0x29   : > { %s678_s18 = scalar_lea.vmem %s3337_s16, %s2458_s20  ;;  %s2956_s26 = scalar_lea.vmem %s3293_s10, %s2296_s25 }
  0x2a   : > { %s2930_s1 = scalar_lea.vmem %s3338_s4, %s2296_s25  ;;  %s714_s17 = scalar_lea.vmem %s3294_s11, %s2913_s21 }
  0x2b   : > { %s722_s28 = scalar_lea.vmem %s3296_s13, %s2913_s21  ;;  %s3341_s4 = sld [smem:[#allocation8_spill]] }
  0x2d   : > { %s2939_s2 = scalar_lea.vmem %s3339_s6, %s2296_s25  ;;  %s2299_s6 = sshll.u32 %s2913_s21, 5 }
  0x2e   : > { %s2970_s20 = scalar_lea.vmem %s3295_s12, %s2299_s6 }
  0x31   : > { %p2249_p0 = scmp.ne.s32.totalorder %s3341_s4, 0 }
  0x32   : > { %s3342_s30 = sld [smem:[#allocation19_spill]] (!%p2249_p0) }
  0x33   : > { %727 = sbr.rel (%p2249_p0) target bundleno = 62 (0x3e), region = 88 }
  0x38   : > { %v728_v0 = vld [vmem:[%s678_s18] sm:$0xff]  ;;  %vm737_vm0 = vcmask 261120   ;;  %v729_v2 = vld [vmem:[%s678_s18 + $0x8] sm:$0xff]  ;;  %v730_v5 = vld [vmem:[%s678_s18 + $0x10] sm:$0x1]  ;;  %vm740_vm1 = vcmask 253952  }
  0x39   : > { %v731_v1 = vld [vmem:[%s3342_s30] sm:$0xff]  ;;  %v732_v4 = vld [vmem:[%s3342_s30 + $0x8] sm:$0xff]  ;;  %v733_v6 = vld [vmem:[%s3342_s30 + $0x10] sm:$0x1] }
  0x3a   : > { %v734_v3 = vadd.f32 %v731_v1, %v728_v0  ;;  %v735_v7 = vadd.f32 %v732_v4, %v729_v2  ;;  %v736_v8 = vadd.f32 %v733_v6, %v730_v5 }
  0x3c   : > { %738 = vst.msk [vmem:[#allocation2] sm:$0xff] %vm737_vm0, %v734_v3  ;;  %739 = vst.msk [vmem:[#allocation2 + $0x8] sm:$0xff] %vm737_vm0, %v735_v7 }
  0x3d   : > { %741 = vst.msk [vmem:[#allocation2 + $0x10] sm:$0x1] %vm740_vm1, %v736_v8 }
  0x3e PF: > { %vm747_vm2 = vcmask 261120   ;;  %vm754_vm3 = vcmask 253952   ;;  %v2560_v30 = vld [vmem:[%s2930_s1 + $0x8] sm:$0xff]   ;;  %v2561_v31 = vld [vmem:[%s2930_s1] sm:$0xff]   ;;  %s3343_s16 = sld [smem:[#allocation20_spill]]  ;;  %s3345_s25 = scalar_lea.vmem %s3286_s3, %s2913_s21  ;;  %vm894_vm4 = vcmask 64512  }
  0x3f   : > { %2350 = vmatprep.subr.bf16.mxu0 %v2560_v30  ;;  %v2251_v49 = vld [vmem:[%s3345_s25] ss:$0 sm:$0xff]  ;;  %s3346_s27 = scalar_lea.vmem %s3288_s5, %s2913_s21  ;;  %s2738_s6 = smov 96   ;;  %vm958_vm5 = vcmask 138240   ;;  %vm965_vm6 = vcmask 131072   ;;  %vm1006_vm7 = vcmask 1040384  }
  0x40   : > { %2351 = vmatpush3.bf16.msra.mxu0 %v2560_v30  ;;  %v2252_v57 = vld [vmem:[%s3346_s27] ss:$0 sm:$0xff]  ;;  %s2739_s0 = smov 64   ;;  %s2740_s1 = smov 120   ;;  %vm1603_vm8 = vcmask 130048   ;;  %vm1607_vm9 = vcmask 195584  }
  0x41   : > { %2352 = vmatprep.subr.bf16.mxu0 %v2561_v31  ;;  %s2741_s18 = smov 88   ;;  %s2745_s14 = smov 112   ;;  %vm1953_vm13 = vcmask 523264  }
  0x42   : > { %s2746_s4 = smov 48   ;;  %s2747_s25 = smov 72  }
  0x43   : > { %v2986_v9 = vld [vmem:[#allocation2] sm:$0xff]  ;;  %v2990_v11 = vld [vmem:[#allocation2 + $0x8] sm:$0xff]  ;;  %s2748_s24 = smov 104   ;;  %s2749_s29 = smov 40  }
  0x44   : > { %v2988_v10 = vld [vmem:[#allocation2 + $0x10] sm:$0x1]  ;;  %v748_v12 = vsel %vm747_vm2, %v2986_v9, 0.0  ;;  %v751_v14 = vsel %vm747_vm2, %v2990_v11, 0.0  ;;  %2353 = vmatpush3.bf16.msra.mxu0 %v2561_v31  ;;  %s3344_s19 = scalar_lea.vmem %s3343_s16, %s2913_s21  ;;  %s2743_s16 = smov 56  }
  0x45   : > { %v755_v13 = vsel %vm754_vm3, %v2988_v10, 0.0  ;;  %749 = vadd.xlane.f32.xlu0 %v748_v12  ;;  %v2250_v43 = vld [vmem:[%s3344_s19] ss:$0 sm:$0xff]  ;;  %s2744_s19 = smov 80   ;;  %s2750_s27 = smov 8  }
  0x46   : > { %756 = vadd.xlane.f32.xlu1 %v755_v13 }
  0x49   : > { %752 = vadd.xlane.f32.xlu0 %v751_v14 }
  0xce   : > { %v750_v15 = vpop.xlane.xlu0 %749 }
  0xcf   : > { %v757_v16 = vpop.xlane.xlu1 %756  ;;  %v759_v17 = vmul.f32 0.03125, %v750_v15 }
  0xd0   : > { %v761_v18 = vmul.f32 0.03125, %v757_v16 }
  0xd1   : > { %v762_v19 = vsub.f32 %v2986_v9, %v759_v17 }
  0xd2   : > { %v764_v20 = vsub.f32 %v2988_v10, %v761_v18  ;;  %v753_v21 = vpop.xlane.xlu0 %752 }
  0xd3   : > { %v760_v22 = vmul.f32 0.03125, %v753_v21  ;;  %v765_v23 = vmul.f32 %v762_v19, %v762_v19 }
  0xd4   : > { %v767_v24 = vmul.f32 %v764_v20, %v764_v20 }
  0xd5   : > { %v763_v25 = vsub.f32 %v2990_v11, %v760_v22  ;;  %v768_v26 = vsel %vm747_vm2, %v765_v23, 0.0 }
  0xd6   : > { %769 = vadd.xlane.f32.xlu1 %v768_v26  ;;  %v774_v27 = vsel %vm754_vm3, %v767_v24, 0.0 }
  0xd7   : > { %v766_v28 = vmul.f32 %v763_v25, %v763_v25 }
  0xd9   : > { %v771_v29 = vsel %vm747_vm2, %v766_v28, 0.0 }
  0xda   : > { %775 = vadd.xlane.f32.xlu1 %v774_v27  ;;  %772 = vadd.xlane.f32.xlu0 %v771_v29 }
 0x15f   : > { %v770_v32 = vpop.xlane.xlu1 %769 }
 0x160   : > { %v777_v33 = vmul.f32 0.03125, %v770_v32 }
 0x162   : > { %v780_v34 = vadd.f32 1e-06, %v777_v33 }
 0x163   : > { %v776_v35 = vpop.xlane.xlu1 %775  ;;  %v773_v36 = vpop.xlane.xlu0 %772 }
 0x164   : > { %2570 = vrsqrt.f32 %v780_v34  ;;  %v779_v37 = vmul.f32 0.03125, %v776_v35  ;;  %v778_v38 = vmul.f32 0.03125, %v773_v36  ;;  %v2742_v36 = vmov 0  }
 0x166   : > { %v782_v39 = vadd.f32 1e-06, %v779_v37  ;;  %v781_v40 = vadd.f32 1e-06, %v778_v38  ;;  %v3049_v37 = vsel %vm1006_vm7, 65535, %v2742_v36 }
 0x168   : > { %2572 = vrsqrt.f32 %v782_v39 }
 0x169   : > { %2574 = vrsqrt.f32 %v781_v40 }
 0x171   : > { %v2571_v41 = vpop.eup %2570 }
 0x172   : > { %v786_v42 = vmul.f32 %v2571_v41, %v762_v19 }
 0x174   : > { %v795_v48 = vmul.f32 %v2250_v43, %v786_v42 }
 0x175   : > { %v2573_v44 = vpop.eup %2572 }
 0x176   : > { %v2575_v45 = vpop.eup %2574  ;;  %v788_v46 = vmul.f32 %v2573_v44, %v764_v20  ;;  %v804_v53 = vadd.f32 %v2251_v49, %v795_v48 }
 0x177   : > { %v787_v47 = vmul.f32 %v2575_v45, %v763_v25 }
 0x178   : > { %v797_v50 = vmul.f32 %v2250_v43, %v788_v46 }
 0x179   : > { %v796_v51 = vmul.f32 %v2250_v43, %v787_v47 }
 0x17a   : > { %v806_v52 = vadd.f32 %v2251_v49, %v797_v50 }
 0x17b   : > { %v805_v54 = vadd.f32 %v2251_v49, %v796_v51 }
 0x17c   : > { %v808_v55 = vpack.c.bf16 %v806_v52, %v806_v52 }
 0x17d   : > { %v807_v56 = vpack.c.bf16 %v805_v54, %v804_v53 }
 0x17f   : > { %2354 = vmatprep.mubr.msk.bf16.mxu0 %vm747_vm2, %v807_v56 }
 0x180   : > { %2355 = vmatmul.mubr.msk.bf16.vlgmr.msra.gmra.mxu0 %vm747_vm2, %v808_v55 }
 0x240   : > { %v2356_v58 = vpop.f32.mrf.mxu0 }
 0x241   : > { %v881_v59 = vadd.f32 %v2356_v58, %v2252_v57 }
 0x242   : > { %v872_v60 = vpop.f32.mrf.mxu0 }
 0x243   : > { %v3023_v61 = vpack.c.bf16 %v881_v59, %v881_v59  ;;  %v873_v0 = vadd.f32 %v2252_v57, %v872_v60 }
 0x244   : > { %v2357_v62 = vpop.f32.mrf.mxu0 }
 0x245   : > { %892 = vrot.lane.b32.xlu0 %v3023_v61, %s2738_s6 }
 0x246   : > { %v875_v63 = vpop.f32.mrf.mxu0 }
 0x247   : > { %v876_v1 = vadd.f32 %v2252_v57, %v875_v63 }
 0x249   : > { %v3026_v2 = vpack.c.bf16 %v876_v1, %v873_v0 }
 0x24b   : > { %890 = vrot.lane.b32.xlu1 %v3026_v2, %s2738_s6  ;;  %2362 = vmatprep.mubr.msk.bf16.mxu1 %vm894_vm4, %v3026_v2  ;;  %s2751_s6 = smov 16  }
 0x2b7   : > { %v893_v3 = vpop.permute.xlu0 %892 }
 0x2b8   : > { %2450 = vmatprep.subr.msk.bf16.mxu1 %vm894_vm4, %v893_v3  ;;  %v905_v4 = vsel %vm894_vm4, %v893_v3, 0 }
 0x2b9   : > { %2359 = vmatpush3.bf16.xpose.msra.mxu1 %v905_v4 }
 0x2bd   : > { %v891_v5 = vpop.permute.xlu1 %890 }
 0x2be   : > { %2451 = vmatprep.subr.msk.bf16.mxu1 %vm894_vm4, %v891_v5  ;;  %v902_v6 = vsel %vm894_vm4, %v891_v5, 0 }
 0x2c1   : > { %2361 = vmatpush3.bf16.xpose.msra.mxu1 %v902_v6 }
 0x2c8   : > { %2363 = vmatmul.mubr.msk.bf16.vlgmr.msra.gmra.mxu1 %vm894_vm4, %v3023_v61 }
 0x388   : > { %v2364_v7 = vpop.f32.mrf.mxu1 }
 0x389   : > { %v957_v17 = vmul.f32 0.35355338, %v2364_v7 }
 0x38a   : > { %v941_v8 = vpop.f32.mrf.mxu1 }
 0x38b   : > { %v955_v12 = vmul.f32 0.35355338, %v941_v8  ;;  %v966_v19 = vsel %vm965_vm6, %v957_v17, -inf }
 0x38c   : > { %v2365_v13 = vpop.f32.mrf.mxu1 }
 0x38d   : > { %v959_v14 = vsel %vm958_vm5, %v955_v12, -inf }
 0x38e   : > { %960 = vmax.xlane.f32.xlu1 %v959_v14  ;;  %v944_v15 = vpop.f32.mrf.mxu1 }
 0x38f   : > { %v956_v16 = vmul.f32 0.35355338, %v944_v15 }
 0x391   : > { %v962_v18 = vsel %vm958_vm5, %v956_v16, -inf }
 0x392   : > { %963 = vmax.xlane.f32.xlu0 %v962_v18 }
 0x396   : > { %967 = vmax.xlane.f32.xlu0 %v966_v19 }
 0x417   : > { %v961_v20 = vpop.xlane.xlu1 %960 }
 0x418   : > { %v969_v23 = vsub.f32 %v955_v12, %v961_v20 }
 0x41a   : > { %v972_v27 = vmul.f32 1.442695, %v969_v23 }
 0x41b   : > { %v964_v21 = vpop.xlane.xlu0 %963 }
 0x41c   : > { %v970_v22 = vsub.f32 %v956_v16, %v964_v21 }
 0x41e   : > { %v974_v24 = vmul.f32 1.442695, %v970_v22 }
 0x41f   : > { %v968_v25 = vpop.xlane.xlu0 %967 }
 0x420   : > { %2576 = vpow2.f32 %v974_v24  ;;  %v971_v26 = vsub.f32 %v957_v17, %v968_v25 }
 0x422   : > { %v976_v28 = vmul.f32 1.442695, %v971_v26 }
 0x424   : > { %2578 = vpow2.f32 %v976_v28 }
 0x425   : > { %2580 = vpow2.f32 %v972_v27 }
 0x42d   : > { %v2577_v29 = vpop.eup %2576 }
 0x42e   : > { %v981_v30 = vsel %vm958_vm5, %v2577_v29, 0.0 }
 0x42f   : > { %982 = vadd.xlane.f32.xlu0 %v981_v30 }
 0x431   : > { %v2579_v31 = vpop.eup %2578 }
 0x432   : > { %v984_v32 = vsel %vm965_vm6, %v2579_v31, 0.0  ;;  %v2581_v33 = vpop.eup %2580 }
 0x433   : > { %985 = vadd.xlane.f32.xlu1 %v984_v32  ;;  %v978_v34 = vsel %vm958_vm5, %v2581_v33, 0.0 }
 0x437   : > { %979 = vadd.xlane.f32.xlu1 %v978_v34 }
 0x445   : > { %997 = vrot.lane.b32.xlu0 %v3023_v61, %s2739_s0 }
 0x448   : > { %995 = vrot.lane.b32.xlu1 %v3026_v2, %s2739_s0  ;;  %s2752_s0 = smov 24  }
 0x449   : > { %1060 = vrot.lane.b32.xlu0 %v3026_v2, %s2740_s1 }
 0x44c   : > { %1066 = vrot.lane.b32.xlu1 %v3023_v61, %s2741_s18 }
 0x450   : > { %1064 = vrot.lane.b32.xlu1 %v3026_v2, %s2741_s18  ;;  %s3347_s18 = scalar_lea.vmem %s3290_s7, %s2913_s21 }
 0x454   : > { %1062 = vrot.lane.b32.xlu1 %v3023_v61, %s2740_s1 }
 0x4b8   : > { %v983_v35 = vpop.xlane.xlu0 %982 }
 0x4bc   : > { %v986_v38 = vpop.xlane.xlu1 %985  ;;  %v998_v39 = vpop.permute.xlu0 %997 }
 0x4bd   : > { %v1010_v40 = vand.u32 %v3049_v37, %v998_v39  ;;  %2582 = vrcp.f32 %v986_v38 }
 0x4be   : > { %2584 = vrcp.f32 %v983_v35 }
 0x4bf   : > { %2366 = vmatprep.subr.bf16.mxu0 %v1010_v40 }
 0x4c0   : > { %v980_v41 = vpop.xlane.xlu1 %979  ;;  %2367 = vmatpush3.bf16.msra.mxu0 %v1010_v40  ;;  %v1061_v52 = vpop.permute.xlu0 %1060 }
 0x4c1   : > { %2586 = vrcp.f32 %v980_v41 }
 0x4c4   : > { %v996_v42 = vpop.permute.xlu1 %995 }
 0x4c5   : > { %2368 = vmatprep.subr.bf16.mxu0 %v996_v42 }
 0x4c6   : > { %2369 = vmatpush3.bf16.msra.mxu0 %v996_v42 }
 0x4c8   : > { %v1067_v43 = vpop.permute.xlu1 %1066 }
 0x4c9   : > { %2452 = vmatprep.subr.msk.bf16.mxu0 %vm894_vm4, %v1067_v43  ;;  %v1078_v53 = vsel %vm894_vm4, %v1067_v43, 0 }
 0x4ca   : > { %v2583_v44 = vpop.eup %2582 }
 0x4cb   : > { %v2585_v45 = vpop.eup %2584  ;;  %v992_v47 = vmul.f32 %v2583_v44, %v2579_v31 }
 0x4cc   : > { %v991_v49 = vmul.f32 %v2585_v45, %v2577_v29  ;;  %v1065_v54 = vpop.permute.xlu1 %1064 }
 0x4cd   : > { %v994_v51 = vpack.c.bf16 %v992_v47, %v992_v47  ;;  %v1075_v55 = vsel %vm894_vm4, %v1065_v54, 0 }
 0x4ce   : > { %v2587_v46 = vpop.eup %2586 }
 0x4cf   : > { %v990_v48 = vmul.f32 %v2587_v46, %v2581_v33 }
 0x4d0   : > { %v1063_v56 = vpop.permute.xlu1 %1062 }
 0x4d1   : > { %v993_v50 = vpack.c.bf16 %v991_v49, %v990_v48 }
 0x4d3   : > { %2370 = vmatprep.mubr.msk.bf16.mxu0 %vm958_vm5, %v993_v50 }
 0x4d4   : > { %2371 = vmatmul.mubr.msk.bf16.vlgmr.msra.gmra.mxu0 %vm958_vm5, %v994_v51 }
 0x4d5   : > { %2375 = vmatpush3.bf16.xpose.msra.mxu0 %v1078_v53  ;;  %2378 = vmatprep.mubr.msk.bf16.mxu0 %vm894_vm4, %v1061_v52 }
 0x4d6   : > { %2453 = vmatprep.subr.msk.bf16.mxu0 %vm894_vm4, %v1065_v54 }
 0x4dd   : > { %2377 = vmatpush3.bf16.xpose.msra.mxu0 %v1075_v55 }
 0x4e4   : > { %2379 = vmatmul.mubr.msk.bf16.vlgmr.msra.gmra.mxu0 %vm894_vm4, %v1063_v56 }
 0x594   : > { %v3060_v57 = vpop.f32.mrf.mxu0 }
 0x596   : > { %v3062_v58 = vpop.f32.mrf.mxu0 }
 0x598   : > { %v2373_v59 = vpop.f32.mrf.mxu0 }
 0x59a   : > { %v3064_v60 = vpop.f32.mrf.mxu0 }
 0x5a4   : > { %v2380_v62 = vpop.f32.mrf.mxu0 }
 0x5a5   : > { %v1130_v3 = vmul.f32 0.35355338, %v2380_v62 }
 0x5a6   : > { %v1114_v63 = vpop.f32.mrf.mxu0 }
 0x5a7   : > { %v1128_v0 = vmul.f32 0.35355338, %v1114_v63  ;;  %v1137_v7 = vsel %vm965_vm6, %v1130_v3, -inf }
 0x5a8   : > { %v2381_v1 = vpop.f32.mrf.mxu0 }
 0x5a9   : > { %v1131_v4 = vsel %vm958_vm5, %v1128_v0, -inf }
 0x5aa   : > { %1132 = vmax.xlane.f32.xlu0 %v1131_v4  ;;  %v1117_v5 = vpop.f32.mrf.mxu0 }
 0x5ab   : > { %v1129_v6 = vmul.f32 0.35355338, %v1117_v5 }
 0x5ad   : > { %v1134_v8 = vsel %vm958_vm5, %v1129_v6, -inf }
 0x5ae   : > { %1138 = vmax.xlane.f32.xlu0 %v1137_v7  ;;  %1135 = vmax.xlane.f32.xlu1 %v1134_v8 }
 0x633   : > { %v1133_v12 = vpop.xlane.xlu0 %1132 }
 0x634   : > { %v1140_v13 = vsub.f32 %v1128_v0, %v1133_v12 }
 0x636   : > { %v1143_v14 = vmul.f32 1.442695, %v1140_v13 }
 0x637   : > { %v1139_v15 = vpop.xlane.xlu0 %1138  ;;  %v1136_v16 = vpop.xlane.xlu1 %1135 }
 0x638   : > { %2588 = vpow2.f32 %v1143_v14  ;;  %v1142_v17 = vsub.f32 %v1130_v3, %v1139_v15  ;;  %v1141_v18 = vsub.f32 %v1129_v6, %v1136_v16 }
 0x63a   : > { %v1147_v19 = vmul.f32 1.442695, %v1142_v17  ;;  %v1145_v20 = vmul.f32 1.442695, %v1141_v18 }
 0x63c   : > { %2590 = vpow2.f32 %v1147_v19 }
 0x63d   : > { %2592 = vpow2.f32 %v1145_v20 }
 0x645   : > { %v2589_v21 = vpop.eup %2588 }
 0x646   : > { %v1149_v22 = vsel %vm958_vm5, %v2589_v21, 0.0 }
 0x647   : > { %1150 = vadd.xlane.f32.xlu0 %v1149_v22 }
 0x649   : > { %v2591_v23 = vpop.eup %2590 }
 0x64a   : > { %v2593_v24 = vpop.eup %2592  ;;  %v1155_v25 = vsel %vm965_vm6, %v2591_v23, 0.0 }
 0x64b   : > { %1156 = vadd.xlane.f32.xlu1 %v1155_v25  ;;  %v1152_v26 = vsel %vm958_vm5, %v2593_v24, 0.0 }
 0x64c   : > { %1153 = vadd.xlane.f32.xlu0 %v1152_v26 }
 0x65c   : > { %1166 = vrot.lane.b32.xlu1 %v3026_v2, %s2743_s16 }
 0x660   : > { %1234 = vrot.lane.b32.xlu1 %v3023_v61, %s2744_s19 }
 0x662   : > { %1168 = vrot.lane.b32.xlu0 %v3023_v61, %s2743_s16 }
 0x664   : > { %1232 = vrot.lane.b32.xlu1 %v3026_v2, %s2744_s19  ;;  %s3348_s19 = scalar_lea.vmem %s3291_s8, %s2913_s21  ;;  %s3349_s21 = sld [smem:[#allocation8_spill]] }
 0x666   : > { %1228 = vrot.lane.b32.xlu0 %v3026_v2, %s2745_s14 }
 0x668   : > { %1230 = vrot.lane.b32.xlu1 %v3023_v61, %s2745_s14 }
 0x66a   : > { %p2292_p1 = scmp.ne.s32.totalorder %s3349_s21, 1 }
 0x6d0   : > { %v1151_v27 = vpop.xlane.xlu0 %1150 }
 0x6d1   : > { %2594 = vrcp.f32 %v1151_v27 }
 0x6d4   : > { %v1157_v28 = vpop.xlane.xlu1 %1156 }
 0x6d5   : > { %v1154_v29 = vpop.xlane.xlu0 %1153  ;;  %2596 = vrcp.f32 %v1157_v28 }
 0x6d6   : > { %2598 = vrcp.f32 %v1154_v29 }
 0x6d8   : > { %v1167_v32 = vpop.permute.xlu1 %1166 }
 0x6d9   : > { %v1169_v30 = vpop.permute.xlu0 %1168 }
 0x6da   : > { %v1178_v31 = vand.u32 %v1169_v30, %v3049_v37 }
 0x6dc   : > { %2382 = vmatprep.subr.bf16.mxu1 %v1178_v31  ;;  %v1235_v34 = vpop.permute.xlu1 %1234 }
 0x6dd   : > { %2383 = vmatpush3.bf16.msra.mxu1 %v1178_v31  ;;  %v1229_v43 = vpop.permute.xlu0 %1228  ;;  %v1246_v44 = vsel %vm894_vm4, %v1235_v34, 0 }
 0x6de   : > { %2384 = vmatprep.subr.bf16.mxu1 %v1167_v32  ;;  %v2595_v33 = vpop.eup %2594 }
 0x6df   : > { %v1161_v39 = vmul.f32 %v2595_v33, %v2589_v21 }
 0x6e0   : > { %v1233_v45 = vpop.permute.xlu1 %1232 }
 0x6e1   : > { %2385 = vmatpush3.bf16.msra.mxu1 %v1167_v32  ;;  %v1243_v46 = vsel %vm894_vm4, %v1233_v45, 0 }
 0x6e2   : > { %v2597_v35 = vpop.eup %2596  ;;  %2454 = vmatprep.subr.msk.bf16.mxu1 %vm894_vm4, %v1235_v34 }
 0x6e3   : > { %v2599_v36 = vpop.eup %2598  ;;  %v1163_v38 = vmul.f32 %v2597_v35, %v2591_v23 }
 0x6e4   : > { %v1162_v40 = vmul.f32 %v2599_v36, %v2593_v24  ;;  %v1231_v47 = vpop.permute.xlu1 %1230 }
 0x6e5   : > { %v1165_v41 = vpack.c.bf16 %v1163_v38, %v1163_v38 }
 0x6e6   : > { %v1164_v42 = vpack.c.bf16 %v1162_v40, %v1161_v39 }
 0x6e8   : > { %2386 = vmatprep.mubr.msk.bf16.mxu1 %vm958_vm5, %v1164_v42 }
 0x6e9   : > { %2387 = vmatmul.mubr.msk.bf16.vlgmr.msra.gmra.mxu1 %vm958_vm5, %v1165_v41 }
 0x6ea   : > { %2391 = vmatpush3.bf16.xpose.msra.mxu1 %v1246_v44  ;;  %2394 = vmatprep.mubr.msk.bf16.mxu1 %vm894_vm4, %v1229_v43 }
 0x6eb   : > { %2455 = vmatprep.subr.msk.bf16.mxu1 %vm894_vm4, %v1233_v45 }
 0x6f2   : > { %2393 = vmatpush3.bf16.xpose.msra.mxu1 %v1243_v46 }
 0x6f9   : > { %2395 = vmatmul.mubr.msk.bf16.vlgmr.msra.gmra.mxu1 %vm894_vm4, %v1231_v47 }
 0x7a9   : > { %v3087_v48 = vpop.f32.mrf.mxu1 }
 0x7ab   : > { %v3089_v49 = vpop.f32.mrf.mxu1 }
 0x7ad   : > { %v2389_v50 = vpop.f32.mrf.mxu1 }
 0x7af   : > { %v3091_v51 = vpop.f32.mrf.mxu1 }
 0x7b0   : > { %v2545_v52 = vpack.i.bf16 %v3091_v51, %v3089_v49 }
 0x7b9   : > { %v2396_v53 = vpop.f32.mrf.mxu1 }
 0x7ba   : > { %v1298_v59 = vmul.f32 0.35355338, %v2396_v53 }
 0x7bb   : > { %v1282_v54 = vpop.f32.mrf.mxu1 }
 0x7bc   : > { %v1296_v55 = vmul.f32 0.35355338, %v1282_v54  ;;  %v1305_v1 = vsel %vm965_vm6, %v1298_v59, -inf }
 0x7bd   : > { %v2397_v56 = vpop.f32.mrf.mxu1 }
 0x7be   : > { %v1299_v62 = vsel %vm958_vm5, %v1296_v55, -inf }
 0x7bf   : > { %1300 = vmax.xlane.f32.xlu0 %v1299_v62  ;;  %v1285_v63 = vpop.f32.mrf.mxu1 }
 0x7c0   : > { %v1297_v0 = vmul.f32 0.35355338, %v1285_v63 }
 0x7c2   : > { %v1302_v3 = vsel %vm958_vm5, %v1297_v0, -inf }
 0x7c3   : > { %1306 = vmax.xlane.f32.xlu0 %v1305_v1  ;;  %1303 = vmax.xlane.f32.xlu1 %v1302_v3 }
 0x848   : > { %v1301_v4 = vpop.xlane.xlu0 %1300 }
 0x849   : > { %v1308_v5 = vsub.f32 %v1296_v55, %v1301_v4 }
 0x84b   : > { %v1311_v6 = vmul.f32 1.442695, %v1308_v5 }
 0x84c   : > { %v1307_v7 = vpop.xlane.xlu0 %1306  ;;  %v1304_v8 = vpop.xlane.xlu1 %1303 }
 0x84d   : > { %2600 = vpow2.f32 %v1311_v6  ;;  %v1310_v12 = vsub.f32 %v1298_v59, %v1307_v7  ;;  %v1309_v13 = vsub.f32 %v1297_v0, %v1304_v8 }
 0x84f   : > { %v1315_v14 = vmul.f32 1.442695, %v1310_v12  ;;  %v1313_v15 = vmul.f32 1.442695, %v1309_v13 }
 0x851   : > { %2602 = vpow2.f32 %v1315_v14 }
 0x852   : > { %2604 = vpow2.f32 %v1313_v15 }
 0x85a   : > { %v2601_v16 = vpop.eup %2600 }
 0x85b   : > { %v1317_v17 = vsel %vm958_vm5, %v2601_v16, 0.0 }
 0x85c   : > { %1318 = vadd.xlane.f32.xlu0 %v1317_v17 }
 0x85e   : > { %v2603_v18 = vpop.eup %2602 }
 0x85f   : > { %v2605_v19 = vpop.eup %2604  ;;  %v1323_v20 = vsel %vm965_vm6, %v2603_v18, 0.0 }
 0x860   : > { %1324 = vadd.xlane.f32.xlu1 %v1323_v20  ;;  %v1320_v21 = vsel %vm958_vm5, %v2605_v19, 0.0 }
 0x861   : > { %1321 = vadd.xlane.f32.xlu0 %v1320_v21 }
 0x871   : > { %1334 = vrot.lane.b32.xlu1 %v3026_v2, %s2746_s4 }
 0x875   : > { %1402 = vrot.lane.b32.xlu1 %v3023_v61, %s2747_s25 }
 0x877   : > { %1336 = vrot.lane.b32.xlu0 %v3023_v61, %s2746_s4 }
 0x879   : > { %1400 = vrot.lane.b32.xlu1 %v3026_v2, %s2747_s25 }
 0x87b   : > { %1396 = vrot.lane.b32.xlu0 %v3026_v2, %s2748_s24 }
 0x87d   : > { %1398 = vrot.lane.b32.xlu1 %v3023_v61, %s2748_s24 }
 0x8e5   : > { %v1319_v22 = vpop.xlane.xlu0 %1318 }
 0x8e6   : > { %2606 = vrcp.f32 %v1319_v22 }
 0x8e9   : > { %v1325_v23 = vpop.xlane.xlu1 %1324 }
 0x8ea   : > { %v1322_v24 = vpop.xlane.xlu0 %1321  ;;  %2608 = vrcp.f32 %v1325_v23 }
 0x8eb   : > { %2610 = vrcp.f32 %v1322_v24 }
 0x8ed   : > { %v1335_v27 = vpop.permute.xlu1 %1334 }
 0x8ee   : > { %v1337_v25 = vpop.permute.xlu0 %1336 }
 0x8ef   : > { %v1346_v26 = vand.u32 %v1337_v25, %v3049_v37 }
 0x8f1   : > { %2398 = vmatprep.subr.bf16.mxu0 %v1346_v26  ;;  %v1403_v29 = vpop.permute.xlu1 %1402 }
 0x8f2   : > { %2399 = vmatpush3.bf16.msra.mxu0 %v1346_v26  ;;  %v1397_v38 = vpop.permute.xlu0 %1396  ;;  %v1414_v39 = vsel %vm894_vm4, %v1403_v29, 0 }
 0x8f3   : > { %2400 = vmatprep.subr.bf16.mxu0 %v1335_v27  ;;  %v2607_v28 = vpop.eup %2606 }
 0x8f4   : > { %v1329_v33 = vmul.f32 %v2607_v28, %v2601_v16 }
 0x8f5   : > { %v1401_v40 = vpop.permute.xlu1 %1400 }
 0x8f6   : > { %2401 = vmatpush3.bf16.msra.mxu0 %v1335_v27  ;;  %v1411_v41 = vsel %vm894_vm4, %v1401_v40, 0 }
 0x8f7   : > { %v2609_v30 = vpop.eup %2608  ;;  %2456 = vmatprep.subr.msk.bf16.mxu0 %vm894_vm4, %v1403_v29  ;;  %v2563_v29 = vld [vmem:[%s2939_s2] sm:$0xff]  }
 0x8f8   : > { %v2611_v31 = vpop.eup %2610  ;;  %v1331_v32 = vmul.f32 %v2609_v30, %v2603_v18 }
 0x8f9   : > { %v1330_v34 = vmul.f32 %v2611_v31, %v2605_v19  ;;  %v1399_v42 = vpop.permute.xlu1 %1398 }
 0x8fa   : > { %v1333_v35 = vpack.c.bf16 %v1331_v32, %v1331_v32 }
 0x8fb   : > { %v1332_v36 = vpack.c.bf16 %v1330_v34, %v1329_v33 }
 0x8fd   : > { %2402 = vmatprep.mubr.msk.bf16.mxu0 %vm958_vm5, %v1332_v36 }
 0x8fe   : > { %2403 = vmatmul.mubr.msk.bf16.vlgmr.msra.gmra.mxu0 %vm958_vm5, %v1333_v35 }
 0x8ff   : > { %2407 = vmatpush3.bf16.xpose.msra.mxu0 %v1414_v39  ;;  %2410 = vmatprep.mubr.msk.bf16.mxu0 %vm894_vm4, %v1397_v38 }
 0x900   : > { %2457 = vmatprep.subr.msk.bf16.mxu0 %vm894_vm4, %v1401_v40 }
 0x907   : > { %2409 = vmatpush3.bf16.xpose.msra.mxu0 %v1411_v41 }
 0x90e   : > { %2411 = vmatmul.mubr.msk.bf16.vlgmr.msra.gmra.mxu0 %vm894_vm4, %v1399_v42 }
 0x9be   : > { %v2404_v43 = vpop.f32.mrf.mxu0 }
 0x9c0   : > { %v1382_v44 = vpop.f32.mrf.mxu0 }
 0x9c2   : > { %v2405_v45 = vpop.f32.mrf.mxu0 }
 0x9c4   : > { %v1385_v46 = vpop.f32.mrf.mxu0 }
 0x9c5   : > { %v2550_v47 = vpack.i.bf16 %v1385_v46, %v1382_v44 }
 0x9ce   : > { %v2412_v50 = vpop.f32.mrf.mxu0 }
 0x9cf   : > { %v1466_v56 = vmul.f32 0.35355338, %v2412_v50 }
 0x9d0   : > { %v1450_v53 = vpop.f32.mrf.mxu0 }
 0x9d1   : > { %v1464_v54 = vmul.f32 0.35355338, %v1450_v53  ;;  %v1473_v0 = vsel %vm965_vm6, %v1466_v56, -inf }
 0x9d2   : > { %v2413_v55 = vpop.f32.mrf.mxu0 }
 0x9d3   : > { %v1467_v59 = vsel %vm958_vm5, %v1464_v54, -inf }
 0x9d4   : > { %1468 = vmax.xlane.f32.xlu0 %v1467_v59  ;;  %v1453_v62 = vpop.f32.mrf.mxu0 }
 0x9d5   : > { %v1465_v63 = vmul.f32 0.35355338, %v1453_v62 }
 0x9d7   : > { %v1470_v1 = vsel %vm958_vm5, %v1465_v63, -inf }
 0x9d8   : > { %1474 = vmax.xlane.f32.xlu0 %v1473_v0  ;;  %1471 = vmax.xlane.f32.xlu1 %v1470_v1 }
 0xa5d   : > { %v1469_v3 = vpop.xlane.xlu0 %1468 }
 0xa5e   : > { %v1476_v4 = vsub.f32 %v1464_v54, %v1469_v3 }
 0xa60   : > { %v1479_v5 = vmul.f32 1.442695, %v1476_v4 }
 0xa61   : > { %v1475_v6 = vpop.xlane.xlu0 %1474  ;;  %v1472_v7 = vpop.xlane.xlu1 %1471 }
 0xa62   : > { %2612 = vpow2.f32 %v1479_v5  ;;  %v1478_v8 = vsub.f32 %v1466_v56, %v1475_v6  ;;  %v1477_v12 = vsub.f32 %v1465_v63, %v1472_v7 }
 0xa64   : > { %v1483_v13 = vmul.f32 1.442695, %v1478_v8  ;;  %v1481_v14 = vmul.f32 1.442695, %v1477_v12 }
 0xa66   : > { %2614 = vpow2.f32 %v1483_v13 }
 0xa67   : > { %2616 = vpow2.f32 %v1481_v14 }
 0xa6f   : > { %v2613_v15 = vpop.eup %2612 }
 0xa70   : > { %v1485_v16 = vsel %vm958_vm5, %v2613_v15, 0.0 }
 0xa71   : > { %1486 = vadd.xlane.f32.xlu0 %v1485_v16 }
 0xa73   : > { %v2615_v17 = vpop.eup %2614 }
 0xa74   : > { %v2617_v18 = vpop.eup %2616  ;;  %v1491_v19 = vsel %vm965_vm6, %v2615_v17, 0.0 }
 0xa75   : > { %1492 = vadd.xlane.f32.xlu1 %v1491_v19  ;;  %v1488_v20 = vsel %vm958_vm5, %v2617_v18, 0.0 }
 0xa76   : > { %1489 = vadd.xlane.f32.xlu0 %v1488_v20 }
 0xa86   : > { %1502 = vrot.lane.b32.xlu1 %v3026_v2, %s2749_s29 }
 0xa8a   : > { %2546 = vrot.lane.b32.xlu1 %v2545_v52, %s2750_s27 }
 0xa8c   : > { %1504 = vrot.lane.b32.xlu0 %v3023_v61, %s2749_s29  ;;  %s3350_s29 = sld [smem:[#allocation23_spill]] (!%p2292_p1) }
 0xa8e   : > { %1571 = vrot.lane.b32.xlu1 %v3087_v48, %s2750_s27 }
 0xa90   : > { %2551 = vrot.lane.b32.xlu0 %v2550_v47, %s2751_s6 }
 0xa92   : > { %1583 = vrot.lane.b32.xlu1 %v2404_v43, %s2751_s6 }
 0xafa   : > { %v1487_v21 = vpop.xlane.xlu0 %1486 }
 0xafb   : > { %2618 = vrcp.f32 %v1487_v21 }
 0xafe   : > { %v1493_v22 = vpop.xlane.xlu1 %1492 }
 0xaff   : > { %v1490_v23 = vpop.xlane.xlu0 %1489  ;;  %2620 = vrcp.f32 %v1493_v22 }
 0xb00   : > { %2622 = vrcp.f32 %v1490_v23 }
 0xb02   : > { %v1503_v49 = vpop.permute.xlu1 %1502 }
 0xb03   : > { %v1505_v24 = vpop.permute.xlu0 %1504 }
 0xb04   : > { %v1514_v2 = vand.u32 %v1505_v24, %v3049_v37  ;;  %v2562_v37 = vld [vmem:[%s2939_s2 + $0x8] sm:$0xff]  }
 0xb06   : > { %2414 = vmatprep.subr.bf16.mxu1 %v1514_v2  ;;  %v2547_v35 = vpop.permute.xlu1 %2546 }
 0xb07   : > { %2415 = vmatpush3.bf16.msra.mxu1 %v1514_v2  ;;  %v2552_v38 = vpop.permute.xlu0 %2551  ;;  %v2549_v39 = vunpack.i.h.bf16 %v2547_v35  ;;  %v2548_v40 = vunpack.i.l.bf16 %v2547_v35 }
 0xb08   : > { %2416 = vmatprep.subr.bf16.mxu1 %v1503_v49  ;;  %v2619_v61 = vpop.eup %2618  ;;  %v2554_v42 = vunpack.i.h.bf16 %v2552_v38  ;;  %v2553_v43 = vunpack.i.l.bf16 %v2552_v38 }
 0xb09   : > { %v1497_v25 = vmul.f32 %v2619_v61, %v2613_v15  ;;  %v1601_v44 = vsel %vm894_vm4, %v3064_v60, %v2549_v39  ;;  %v1600_v45 = vsel %vm894_vm4, %v3062_v58, %v2548_v40 }
 0xb0a   : > { %v1572_v36 = vpop.permute.xlu1 %1571  ;;  %v1604_v56 = vsel %vm1603_vm8, %v1600_v45, %v2553_v43  ;;  %v1605_v59 = vsel %vm1603_vm8, %v1601_v44, %v2554_v42  ;;  %v2279_v43 = vld [vmem:[%s706_s23] ss:$0 sm:$0xff] }
 0xb0b   : > { %2417 = vmatpush3.bf16.msra.mxu1 %v1503_v49  ;;  %v1602_v47 = vsel %vm894_vm4, %v3060_v57, %v1572_v36  ;;  %v2273_v57 = vld [vmem:[%s3347_s18] ss:$0 sm:$0xff] }
 0xb0c   : > { %v2621_v48 = vpop.eup %2620  ;;  %2422 = vmatprep.subr.bf16.mxu1 %v2562_v37  ;;  %v2278_v36 = vld [vmem:[%s3348_s19] ss:$0 sm:$0xff] }
 0xb0d   : > { %v2623_v51 = vpop.eup %2622  ;;  %v1499_v52 = vmul.f32 %v2621_v48, %v2615_v17 }
 0xb0e   : > { %v1498_v26 = vmul.f32 %v2623_v51, %v2617_v18  ;;  %v1584_v41 = vpop.permute.xlu1 %1583 }
 0xb0f   : > { %v1501_v27 = vpack.c.bf16 %v1499_v52, %v1499_v52  ;;  %v1606_v53 = vsel %vm1603_vm8, %v1602_v47, %v1584_v41  ;;  %v2564_v52 = vld [vmem:[%s2956_s26 + $0x8] sm:$0xff]  }
 0xb10   : > { %v1500_v28 = vpack.c.bf16 %v1498_v26, %v1497_v25  ;;  %v2565_v25 = vld [vmem:[%s2956_s26] sm:$0xff]   ;;  %2430 = vmatprep.subr.bf16.mxu0 %v2564_v52 }
 0xb11   : > { %2431 = vmatpush3.bf16.msra.mxu0 %v2564_v52 }
 0xb12   : > { %2418 = vmatprep.mubr.msk.bf16.mxu1 %vm958_vm5, %v1500_v28  ;;  %2432 = vmatprep.subr.bf16.mxu0 %v2565_v25 }
 0xb13   : > { %2419 = vmatmul.mubr.msk.bf16.vlgmr.msra.gmra.mxu1 %vm958_vm5, %v1501_v27 }
 0xb14   : > { %2423 = vmatpush3.bf16.msra.mxu1 %v2562_v37 }
 0xb15   : > { %2424 = vmatprep.subr.bf16.mxu1 %v2563_v29  ;;  %2433 = vmatpush3.bf16.msra.mxu0 %v2565_v25 }
 0xb18   : > { %2425 = vmatpush3.bf16.msra.mxu1 %v2563_v29 }
 0xbd3   : > { %v2420_v30 = vpop.f32.mrf.mxu1 }
 0xbd4   : > { %1595 = vrot.lane.b32.xlu1 %v2420_v30, %s2752_s0 }
 0xbd5   : > { %v1550_v31 = vpop.f32.mrf.mxu1 }
 0xbd7   : > { %v2421_v32 = vpop.f32.mrf.mxu1 }
 0xbd9   : > { %v1553_v33 = vpop.f32.mrf.mxu1 }
 0xbda   : > { %v2555_v34 = vpack.i.bf16 %v1553_v33, %v1550_v31 }
 0xbdc   : > { %2556 = vrot.lane.b32.xlu0 %v2555_v34, %s2752_s0  ;;  %s3351_s0 = sld [smem:[#allocation24_spill]] (!%p2292_p1) }
 0xc46   : > { %v1596_v46 = vpop.permute.xlu1 %1595 }
 0xc47   : > { %v1610_v62 = vsel %vm1607_vm9, %v1606_v53, %v1596_v46 }
 0xc48   : > { %v1612_v1 = vpack.c.bf16 %v1610_v62, %v1610_v62  ;;  %v2569_v62 = vld [vmem:[%s2970_s20] sm:$0xff]  }
 0xc4e   : > { %v2557_v50 = vpop.permute.xlu0 %2556 }
 0xc4f   : > { %v2559_v54 = vunpack.i.h.bf16 %v2557_v50  ;;  %v2558_v55 = vunpack.i.l.bf16 %v2557_v50 }
 0xc51   : > { %v1608_v63 = vsel %vm1607_vm9, %v1604_v56, %v2558_v55  ;;  %v1609_v0 = vsel %vm1607_vm9, %v1605_v59, %v2559_v54  ;;  %v2566_v55 = vld [vmem:[%s2970_s20 + $0x18] sm:$0xff]   ;;  %v2567_v56 = vld [vmem:[%s2970_s20 + $0x10] sm:$0xff]   ;;  %v2568_v59 = vld [vmem:[%s2970_s20 + $0x8] sm:$0xff]  }
 0xc52   : > { %v1611_v60 = vpack.c.bf16 %v1609_v0, %v1608_v63  ;;  %2438 = vmatprep.subr.bf16.mxu1 %v2566_v55  ;;  %v2280_v63 = vld [vmem:[%s714_s17] ss:$0 sm:$0xff] }
 0xc54   : > { %2426 = vmatprep.mubr.msk.bf16.mxu1 %vm747_vm2, %v1611_v60 }
 0xc55   : > { %2427 = vmatmul.mubr.msk.bf16.vlgmr.msra.gmra.mxu1 %vm747_vm2, %v1612_v1 }
 0xc56   : > { %2439 = vmatpush3.bf16.msra.mxu1 %v2566_v55 }
 0xc57   : > { %2440 = vmatprep.subr.bf16.mxu1 %v2567_v56 }
 0xc5a   : > { %2441 = vmatpush3.bf16.msra.mxu1 %v2567_v56 }
 0xc5b   : > { %2442 = vmatprep.subr.bf16.mxu1 %v2568_v59 }
 0xc5e   : > { %2443 = vmatpush3.bf16.msra.mxu1 %v2568_v59 }
 0xc5f   : > { %2444 = vmatprep.subr.bf16.mxu1 %v2569_v62 }
 0xc62   : > { %2445 = vmatpush3.bf16.msra.mxu1 %v2569_v62 }
 0xd15   : > { %v2428_v58 = vpop.f32.mrf.mxu1 }
 0xd16   : > { %v1685_v4 = vadd.f32 %v2428_v58, %v2273_v57 }
 0xd17   : > { %v1676_v3 = vpop.f32.mrf.mxu1 }
 0xd18   : > { %v1677_v5 = vadd.f32 %v2273_v57, %v1676_v3  ;;  %v3150_v12 = vadd.f32 %v1685_v4, %v2988_v10 }
 0xd19   : > { %v2429_v6 = vpop.f32.mrf.mxu1 }
 0xd1a   : > { %v3147_v7 = vadd.f32 %v1677_v5, %v2986_v9  ;;  %v1701_v17 = vsel %vm754_vm3, %v3150_v12, 0.0 }
 0xd1b   : > { %v1679_v8 = vpop.f32.mrf.mxu1 }
 0xd1c   : > { %v1680_v13 = vadd.f32 %v2273_v57, %v1679_v8  ;;  %v1695_v14 = vsel %vm747_vm2, %v3147_v7, 0.0 }
 0xd1d   : > { %1696 = vadd.xlane.f32.xlu0 %v1695_v14 }
 0xd1e   : > { %v3155_v15 = vadd.f32 %v1680_v13, %v2990_v11 }
 0xd20   : > { %v1698_v16 = vsel %vm747_vm2, %v3155_v15, 0.0 }
 0xd21   : > { %1699 = vadd.xlane.f32.xlu1 %v1698_v16  ;;  %1702 = vadd.xlane.f32.xlu0 %v1701_v17 }
 0xda6   : > { %v1697_v9 = vpop.xlane.xlu0 %1696 }
 0xda7   : > { %v1704_v18 = vmul.f32 0.03125, %v1697_v9 }
 0xda9   : > { %v1707_v10 = vsub.f32 %v3147_v7, %v1704_v18 }
 0xdaa   : > { %v1700_v19 = vpop.xlane.xlu1 %1699  ;;  %v1703_v20 = vpop.xlane.xlu0 %1702 }
 0xdab   : > { %v1705_v21 = vmul.f32 0.03125, %v1700_v19  ;;  %v1706_v22 = vmul.f32 0.03125, %v1703_v20  ;;  %v1710_v11 = vmul.f32 %v1707_v10, %v1707_v10 }
 0xdad   : > { %v1708_v23 = vsub.f32 %v3155_v15, %v1705_v21  ;;  %v1709_v24 = vsub.f32 %v3150_v12, %v1706_v22  ;;  %v1713_v2 = vsel %vm747_vm2, %v1710_v11, 0.0 }
 0xdae   : > { %1714 = vadd.xlane.f32.xlu0 %v1713_v2 }
 0xdaf   : > { %v1711_v49 = vmul.f32 %v1708_v23, %v1708_v23  ;;  %v1712_v61 = vmul.f32 %v1709_v24, %v1709_v24 }
 0xdb1   : > { %v1716_v48 = vsel %vm747_vm2, %v1711_v49, 0.0  ;;  %v1719_v51 = vsel %vm754_vm3, %v1712_v61, 0.0 }
 0xdb2   : > { %1717 = vadd.xlane.f32.xlu0 %v1716_v48  ;;  %1720 = vadd.xlane.f32.xlu1 %v1719_v51 }
 0xe37   : > { %v1715_v26 = vpop.xlane.xlu0 %1714 }
 0xe38   : > { %v1722_v27 = vmul.f32 0.03125, %v1715_v26 }
 0xe3a   : > { %v1725_v28 = vadd.f32 1e-06, %v1722_v27 }
 0xe3b   : > { %v1721_v37 = vpop.xlane.xlu1 %1720  ;;  %v1718_v29 = vpop.xlane.xlu0 %1717 }
 0xe3c   : > { %2624 = vrsqrt.f32 %v1725_v28  ;;  %v1724_v30 = vmul.f32 0.03125, %v1721_v37  ;;  %v1723_v31 = vmul.f32 0.03125, %v1718_v29 }
 0xe3e   : > { %v1727_v32 = vadd.f32 1e-06, %v1724_v30  ;;  %v1726_v33 = vadd.f32 1e-06, %v1723_v31 }
 0xe40   : > { %2626 = vrsqrt.f32 %v1727_v32 }
 0xe41   : > { %2628 = vrsqrt.f32 %v1726_v33 }
 0xe49   : > { %v2625_v34 = vpop.eup %2624 }
 0xe4a   : > { %v1731_v35 = vmul.f32 %v2625_v34, %v1707_v10 }
 0xe4c   : > { %v1740_v42 = vmul.f32 %v2278_v36, %v1731_v35 }
 0xe4d   : > { %v2627_v38 = vpop.eup %2626 }
 0xe4e   : > { %v2629_v39 = vpop.eup %2628  ;;  %v1733_v40 = vmul.f32 %v2627_v38, %v1709_v24  ;;  %v1749_v47 = vadd.f32 %v2279_v43, %v1740_v42 }
 0xe4f   : > { %v1732_v41 = vmul.f32 %v2629_v39, %v1708_v23 }
 0xe50   : > { %v1742_v44 = vmul.f32 %v2278_v36, %v1733_v40 }
 0xe51   : > { %v1741_v45 = vmul.f32 %v2278_v36, %v1732_v41 }
 0xe52   : > { %v1751_v46 = vadd.f32 %v2279_v43, %v1742_v44 }
 0xe53   : > { %v1750_v50 = vadd.f32 %v2279_v43, %v1741_v45 }
 0xe54   : > { %v1753_v53 = vpack.c.bf16 %v1751_v46, %v1751_v46 }
 0xe55   : > { %v1752_v54 = vpack.c.bf16 %v1750_v50, %v1749_v47 }
 0xe57   : > { %2434 = vmatprep.mubr.msk.bf16.mxu0 %vm747_vm2, %v1752_v54 }
 0xe58   : > { %2435 = vmatmul.mubr.msk.bf16.vlgmr.msra.gmra.mxu0 %vm747_vm2, %v1753_v53 }
 0xf18   : > { %v2436_v0 = vpop.f32.mrf.mxu0 }
 0xf19   : > { %v3190_v60 = vadd.f32 %v2436_v0, %v2280_v63 }
 0xf1a   : > { %v1817_v1 = vpop.f32.mrf.mxu0 }
 0xf1b   : > { %v3193_v58 = vmul.f32 0.70710677, %v3190_v60  ;;  %v3195_v57 = vadd.f32 %v2280_v63, %v1817_v1 }
 0xf1c   : > { %v2437_v3 = vpop.f32.mrf.mxu0 }
 0xf1d   : > { %v1839_v4 = vand.u32 2147483647, %v3193_v58  ;;  %v3199_v5 = vmul.f32 0.70710677, %v3195_v57  ;;  %vm1899_vm10 = vcmp.ge.f32.partialorder %v3193_v58, 0.0 }
 0xf1e   : > { %v1820_v6 = vpop.f32.mrf.mxu0 }
 0xf1f   : > { %v1842_v8 = vmul.f32 0.3275911, %v1839_v4  ;;  %v1837_v13 = vand.u32 2147483647, %v3199_v5  ;;  %v3202_v14 = vadd.f32 %v2280_v63, %v1820_v6  ;;  %v1881_v21 = vsub.f32 0.0, %v1839_v4 }
 0xf20   : > { %vm1897_vm11 = vcmp.ge.f32.partialorder %v3199_v5, 0.0 }
 0xf21   : > { %v1845_v16 = vadd.f32 1.0, %v1842_v8  ;;  %v1840_v17 = vmul.f32 0.3275911, %v1837_v13  ;;  %v3205_v9 = vmul.f32 0.70710677, %v3202_v14  ;;  %v1879_v22 = vsub.f32 0.0, %v1837_v13 }
 0xf22   : > { %v1884_v11 = vmul.f32 %v1881_v21, %v1839_v4  ;;  %v1833_v21 = vmul.f32 0.5, %v3190_v60  ;;  %v1832_v58 = vmul.f32 0.5, %v3202_v14 }
 0xf23   : > { %2630 = vrcp.f32 %v1845_v16  ;;  %v1843_v18 = vadd.f32 1.0, %v1840_v17  ;;  %v1838_v10 = vand.u32 2147483647, %v3205_v9  ;;  %v1882_v24 = vmul.f32 %v1879_v22, %v1837_v13 }
 0xf24   : > { %v1889_v61 = vmul.f32 1.442695, %v1884_v11  ;;  %vm1898_vm12 = vcmp.ge.f32.partialorder %v3205_v9, 0.0  ;;  %v1831_v11 = vmul.f32 0.5, %v3195_v57  ;;  %v2285_v9 = vld [vmem:[%s722_s28] ss:$0 sm:$0xff] }
 0xf25   : > { %2632 = vrcp.f32 %v1843_v18  ;;  %v1841_v19 = vmul.f32 0.3275911, %v1838_v10  ;;  %v1880_v2 = vsub.f32 0.0, %v1838_v10  ;;  %v1885_v25 = vmul.f32 1.442695, %v1882_v24 }
 0xf27   : > { %v1844_v20 = vadd.f32 1.0, %v1841_v19  ;;  %v1883_v26 = vmul.f32 %v1880_v2, %v1838_v10 }
 0xf29   : > { %2634 = vrcp.f32 %v1844_v20  ;;  %v1887_v32 = vmul.f32 1.442695, %v1883_v26 }
 0xf2a   : > { %2636 = vpow2.f32 %v1889_v61 }
 0xf2b   : > { %2638 = vpow2.f32 %v1885_v25 }
 0xf2c   : > { %2640 = vpow2.f32 %v1887_v32 }
 0xf30   : > { %v2631_v23 = vpop.eup %2630 }
 0xf31   : > { %v1854_v49 = vmul.f32 1.0614054, %v2631_v23 }
 0xf32   : > { %v2633_v48 = vpop.eup %2632 }
 0xf33   : > { %v1857_v51 = vadd.f32 -1.4531521, %v1854_v49  ;;  %v1852_v52 = vmul.f32 1.0614054, %v2633_v48 }
 0xf35   : > { %v1860_v27 = vmul.f32 %v2631_v23, %v1857_v51  ;;  %v1855_v28 = vadd.f32 -1.4531521, %v1852_v52 }
 0xf36   : > { %v2635_v37 = vpop.eup %2634 }
 0xf37   : > { %v1863_v29 = vadd.f32 1.4214138, %v1860_v27  ;;  %v1858_v30 = vmul.f32 %v2633_v48, %v1855_v28  ;;  %v1853_v31 = vmul.f32 1.0614054, %v2635_v37  ;;  %v2637_v47 = vpop.eup %2636 }
 0xf38   : > { %v2639_v59 = vpop.eup %2638 }
 0xf39   : > { %v1866_v33 = vmul.f32 %v2631_v23, %v1863_v29  ;;  %v1861_v34 = vadd.f32 1.4214138, %v1858_v30  ;;  %v1856_v35 = vadd.f32 -1.4531521, %v1853_v31  ;;  %v2641_v6 = vpop.eup %2640 }
 0xf3b   : > { %v1869_v36 = vadd.f32 -0.28449672, %v1866_v33  ;;  %v1864_v38 = vmul.f32 %v2633_v48, %v1861_v34  ;;  %v1859_v39 = vmul.f32 %v2635_v37, %v1856_v35 }
 0xf3d   : > { %v1872_v40 = vmul.f32 %v2631_v23, %v1869_v36  ;;  %v1867_v41 = vadd.f32 -0.28449672, %v1864_v38  ;;  %v1862_v42 = vadd.f32 1.4214138, %v1859_v39 }
 0xf3f   : > { %v1875_v43 = vadd.f32 0.2548296, %v1872_v40  ;;  %v1870_v44 = vmul.f32 %v2633_v48, %v1867_v41  ;;  %v1865_v45 = vmul.f32 %v2635_v37, %v1862_v42 }
 0xf41   : > { %v1878_v46 = vmul.f32 %v2631_v23, %v1875_v43  ;;  %v1873_v50 = vadd.f32 0.2548296, %v1870_v44  ;;  %v1868_v53 = vadd.f32 -0.28449672, %v1865_v45 }
 0xf43   : > { %v1893_v54 = vmul.f32 %v2637_v47, %v1878_v46  ;;  %v1876_v55 = vmul.f32 %v2633_v48, %v1873_v50  ;;  %v1871_v56 = vmul.f32 %v2635_v37, %v1868_v53 }
 0xf45   : > { %v1896_v62 = vsub.f32 1.0, %v1893_v54  ;;  %v1891_v63 = vmul.f32 %v2639_v59, %v1876_v55  ;;  %v1874_v0 = vadd.f32 0.2548296, %v1871_v56 }
 0xf47   : > { %v1902_v1 = vsub.f32 0.0, %v1896_v62  ;;  %v1894_v3 = vsub.f32 1.0, %v1891_v63  ;;  %v1877_v4 = vmul.f32 %v2635_v37, %v1874_v0 }
 0xf49   : > { %v1900_v8 = vsub.f32 0.0, %v1894_v3  ;;  %v1892_v13 = vmul.f32 %v2641_v6, %v1877_v4  ;;  %v1905_v16 = vsel %vm1899_vm10, %v1896_v62, %v1902_v1 }
 0xf4a   : > { %v1908_v10 = vadd.f32 1.0, %v1905_v16 }
 0xf4b   : > { %v1903_v17 = vsel %vm1897_vm11, %v1894_v3, %v1900_v8  ;;  %v1895_v18 = vsub.f32 1.0, %v1892_v13 }
 0xf4c   : > { %v1906_v20 = vadd.f32 1.0, %v1903_v17  ;;  %v1911_v24 = vmul.f32 %v1908_v10, %v1833_v21 }
 0xf4d   : > { %v1901_v19 = vsub.f32 0.0, %v1895_v18 }
 0xf4e   : > { %v1909_v2 = vmul.f32 %v1906_v20, %v1831_v11  ;;  %v1913_v61 = vpack.c.bf16 %v1911_v24, %v1911_v24 }
 0xf4f   : > { %v1904_v22 = vsel %vm1898_vm12, %v1895_v18, %v1901_v19 }
 0xf50   : > { %v1907_v23 = vadd.f32 1.0, %v1904_v22 }
 0xf52   : > { %v1910_v49 = vmul.f32 %v1907_v23, %v1832_v58 }
 0xf54   : > { %v1912_v5 = vpack.c.bf16 %v1910_v49, %v1909_v2 }
 0xf56   : > { %2446 = vmatprep.mubr.msk.bf16.mxu1 %vm1953_vm13, %v1912_v5 }
 0xf57   : > { %2447 = vmatmul.mubr.msk.bf16.vlgmr.msra.gmra.mxu1 %vm1953_vm13, %v1913_v61 }
0x1017   : > { %v2448_v60 = vpop.f32.mrf.mxu1 }
0x1018   : > { %v2003_v48 = vadd.f32 %v2448_v60, %v2285_v9 }
0x1019   : > { %v1994_v51 = vpop.f32.mrf.mxu1 }
0x101a   : > { %v2010_v57 = vadd.f32 %v2003_v48, %v3150_v12  ;;  %v1995_v14 = vadd.f32 %v2285_v9, %v1994_v51 }
0x101b   : > { %v2449_v52 = vpop.f32.mrf.mxu1 }
0x101c   : > { %2013 = vst.msk [vmem:[#allocation2 + $0x10] sm:$0x1] %vm754_vm3, %v2010_v57  ;;  %v2008_v25 = vadd.f32 %v1995_v14, %v3147_v7 }
0x101d   : > { %v1997_v26 = vpop.f32.mrf.mxu1 }
0x101e   : > { %2011 = vst.msk [vmem:[#allocation2] sm:$0xff] %vm747_vm2, %v2008_v25  ;;  %v1998_v27 = vadd.f32 %v2285_v9, %v1997_v26  ;;  %2017 = sbr.rel (%p2292_p1) target bundleno = 4440 (0x1158), region = 92 }
0x1020   : > { %v2009_v28 = vadd.f32 %v1998_v27, %v3155_v15 }
0x1022   : > { %2012 = vst.msk [vmem:[#allocation2 + $0x8] sm:$0xff] %vm747_vm2, %v2009_v28 }
0x1023   : > { %v2020_v37 = vsel %vm754_vm3, %v2008_v25, 0.0  ;;  %v2018_v35 = vld [vmem:[%s3350_s29] sm:$0x1] }
0x1024   : > { %2021 = vadd.xlane.f32.xlu0 %v2020_v37  ;;  %v2019_v38 = vld [vmem:[%s3351_s0] sm:$0x1] }
0x10ad   : > { %v2022_v12 = vpop.xlane.xlu0 %2021 }
0x10ae   : > { %v2023_v29 = vmul.f32 0.03125, %v2022_v12 }
0x10b0   : > { %v2024_v30 = vsub.f32 %v2008_v25, %v2023_v29 }
0x10b2   : > { %v2025_v31 = vmul.f32 %v2024_v30, %v2024_v30 }
0x10b4   : > { %v2026_v7 = vsel %vm754_vm3, %v2025_v31, 0.0 }
0x10b5   : > { %2027 = vadd.xlane.f32.xlu0 %v2026_v7 }
0x113e   : > { %v2028_v32 = vpop.xlane.xlu0 %2027 }
0x113f   : > { %v2029_v33 = vmul.f32 0.03125, %v2028_v32 }
0x1141   : > { %v2030_v34 = vadd.f32 1e-06, %v2029_v33 }
0x1143   : > { %2642 = vrsqrt.f32 %v2030_v34 }
0x1150   : > { %v2643_v15 = vpop.eup %2642 }
0x1151   : > { %v2032_v36 = vmul.f32 %v2643_v15, %v2024_v30 }
0x1153   : > { %v2033_v39 = vmul.f32 %v2032_v36, %v2018_v35 }
0x1155   : > { %v2034_v40 = vadd.f32 %v2033_v39, %v2019_v38 }
0x1157   : > { %2035 = vst.msk [vmem:[%s2974_s15] sm:$0x1] %vm754_vm3, %v2034_v40 }
0x1158 PF: > { %s3352_s2 = sld [smem:[#allocation9_spill]]  ;;  %s2049_s4 = sshll.u32 %s2974_s15, 4  ;;  %s2050_s4 = int_to_ptr.vmem [resolvable:$true] %s2049_s4 }
0x1159   : > { %s3354_s19 = sld [smem:[#allocation25_spill]]  ;;  %s3355_s23 = sand.u32 1, %s2712_s22  }
0x115a   : > { %s2037_s25 = scalar_lea.sflag [#allocation4], %s3355_s23  ;;  %s2644_s17 = scalar_lea.vmem %s2050_s4, 16 }
0x115b   : > { %p2645_p2 = scmp.ne.s32.totalorder %s2050_s4, %s2644_s17  ;;  %s2753_s20 = smov [#allocation3]  }
0x115c   : > { %s2648_s21 = sshll.u32 %s2753_s20, 4  ;;  %s2649_s21 = int_to_ptr.vmem [resolvable:$false] %s2648_s21 }
0x115d   : > { %p2646_p4 = pnand %p2645_p2, %p2888_p3  ;;  %s2650_s28 = scalar_lea.vmem %s2649_s21, 32 }
0x115e   : > { %s2293_s18 = sshll.u32 %s3352_s2, 4  ;;  %p2651_p6 = scmp.lt.s32.totalorder %s2050_s4, %s2649_s21 }
0x115f   : > { %s2047_s14 = scalar_lea.hbm %s3354_s19, %s2293_s18  ;;  %p2647_p5 = pneg %p2646_p4 }
0x1160   : > { %p2652_p7 = scmp.lt.s32.totalorder %s2650_s28, %s2644_s17 }
0x1162   : > { %p2653_p8 = por %p2652_p7, %p2651_p6 }
0x1164   : > { %p2654_p10 = pnand %p2653_p8, %p2647_p5 }
0x1166   : > { %2657 = shalt.err (!%p2654_p10)
}
0x1167   : > { %s2658_s24 = scalar_lea.hbm %s2047_s14, 16  ;;  %s2662_s27 = scalar_lea.hbm %s3354_s19, 32 }
0x1168   : > { %p2659_p11 = scmp.ne.s32.totalorder %s2047_s14, %s2658_s24  ;;  %p2663_p0 = scmp.lt.s32.totalorder %s2047_s14, %s3354_s19 }
0x1169   : > { %p2664_p1 = scmp.lt.s32.totalorder %s2662_s27, %s2658_s24 }
0x116a   : > { %p2660_p12 = pnand %p2659_p11, %p2888_p3 }
0x116b   : > { %p2665_p2 = por %p2664_p1, %p2663_p0 }
0x116c   : > { %p2661_p13 = pneg %p2660_p12 }
0x116e   : > { %p2666_p4 = pnand %p2665_p2, %p2661_p13 }
0x1170   : > { %2669 = shalt.err (!%p2666_p4)
}
0x1171   : > { %2459 = dma.vmem_to_hbm [thread:$0]  (%p2888_p3), %s2050_s4, 16, %s2047_s14, %s2037_s25  }
0x1172 PF: > { %s3356_s2 = sld [smem:[#allocation12_spill]] }
0x1173   : > { %s3357_s18 = sld [smem:[#allocation6_spill]] }
0x1178   : > { %p2465_p5 = scmp.ge.s32.totalorder %s3356_s2, 2 }
0x1179   : > { %s2061_s16 = sand.u32 1, %s3357_s18  }
0x117a   : > { %p2462_p6 = pnand %p2465_p5, %p2898_p9  ;;  %s2062_s23 = scalar_lea.sflag [#allocation4], %s2061_s16 }
0x117c   : > { %p2463_p7 = pneg %p2462_p6 }
0x117e   : > { %2703 = dma.done.wait (%p2463_p7), %s2062_s23, 16  }
0x117f   : > { %2705 = vsyncadd (%p2463_p7), %s2062_s23, 4294967280  ;;  %s29_s28 = sadd.s32 1, %s3356_s2   ;;  %s3359_s17 = sld [smem:[#allocation7_spill]] }
0x1180   : > { %p26_p8 = scmp.ge.s32.totalorder %s29_s28, 6   ;;  %s3360_s23 = sld [smem:[#allocation17_spill]] }
0x1181   : > { %s3361_s24 = sld [smem:[#allocation10_spill]]  ;;  %s3365_s21 = smov %s2712_s22 }
0x1182   : > { %s3362_s25 = sld [smem:[#allocation11_spill]]  ;;  %28 = sbr.rel (!%p26_p8) target bundleno = 14 (0xe), region = 163 }
0x1183   : > { %s3363_s26 = sld [smem:[#allocation13_spill]] }
0x1184   : > { %s3364_s27 = sld [smem:[#allocation15_spill]] }
0x1185   : > { %s3366_s22 = smov %s3359_s17 }
0x1187   :  { %2066 = vsyncpa [#allocation4], 1 }
0x1188   :  { %2068 = vsyncpa [#allocation4 + $0x1], 1 }

</bundles_post_ra>
